<compile_context>
chip_gen: v5e
topology: v5e:2x2
jax: 0.10.0
libtpu: 0.0.40
codegen_flags: <defaults>
</compile_context>

<pallas_src>
import jax
import jax.numpy as jnp
from jax.experimental import pallas as pl
from jax.experimental.pallas import tpu as pltpu

IN_FEATURES = 32 * 32 * 3      # 3072
OUT_FEATURES = 10
OUT_PAD = 128                  # lane-dense padded output width
TM_MAX = 512                   # batch tile (bf16 x tile = 512*3072*2 B = 3 MiB)


def _round_up(n, m):
    return ((n + m - 1) // m) * m


def _linear_kernel(x_ref, w_ref, b_ref, o_ref):
    # x_ref: (TM, 3072) bf16   w_ref: (128, 3072) bf16
    # b_ref: (1, 128)   f32    o_ref: (TM, 128)   f32
    acc = jax.lax.dot_general(
        x_ref[...], w_ref[...],
        dimension_numbers=(((1,), (1,)), ((), ())),   # contract K with K (trans_b)
        preferred_element_type=jnp.float32)
    o_ref[...] = acc + b_ref[...]


@jax.jit
def firstnet_forward(x_nchw, weight, bias):
    """x_nchw: (B, 3, 32, 32) f32; weight: (10, 3072) f32; bias: (10,) f32."""
    B = x_nchw.shape[0]
    # Glue: replicate x.view(-1, 32*32*3) (NCHW contiguous flatten order).
    x_flat = x_nchw.reshape(B, IN_FEATURES)

    # Sublane-aligned batch tile; zero-pad batch up to a tile multiple.
    tm = min(TM_MAX, _round_up(B, 8))
    b_pad = _round_up(B, tm)

    x_p = jnp.zeros((b_pad, IN_FEATURES), jnp.bfloat16).at[:B].set(
        x_flat.astype(jnp.bfloat16))
    # Zero-pad weight rows 10 -> 128 (zeros so padded lanes stay clean).
    w_p = jnp.zeros((OUT_PAD, IN_FEATURES), jnp.bfloat16).at[:OUT_FEATURES].set(
        weight.astype(jnp.bfloat16))
    b_p = jnp.zeros((1, OUT_PAD), jnp.float32).at[0, :OUT_FEATURES].set(
        bias.astype(jnp.float32))

    grid = (b_pad // tm,)
    cost = pl.CostEstimate(
        flops=2 * b_pad * IN_FEATURES * OUT_PAD,
        transcendentals=0,
        bytes_accessed=(x_p.size * 2 + w_p.size * 2 + b_p.size * 4
                        + b_pad * OUT_PAD * 4))

    out_p = pl.pallas_call(
        _linear_kernel,
        out_shape=jax.ShapeDtypeStruct((b_pad, OUT_PAD), jnp.float32),
        grid_spec=pltpu.PrefetchScalarGridSpec(
            num_scalar_prefetch=0,
            grid=grid,
            in_specs=[
                pl.BlockSpec((tm, IN_FEATURES), lambda i: (i, 0)),       # x: tiled over batch
                pl.BlockSpec((OUT_PAD, IN_FEATURES), lambda i: (0, 0)),  # weight: resident
                pl.BlockSpec((1, OUT_PAD), lambda i: (0, 0)),            # bias: resident
            ],
            out_specs=pl.BlockSpec((tm, OUT_PAD), lambda i: (i, 0)),
        ),
        compiler_params=pltpu.CompilerParams(
            dimension_semantics=("parallel",)),
        cost_estimate=cost,
    )(x_p, w_p, b_p)

    # Slice away batch + output-feature padding; return input dtype.
    return out_p[:B, :OUT_FEATURES].astype(x_nchw.dtype)


if __name__ == "__main__":
    key = jax.random.PRNGKey(0)
    kx, kw, kb = jax.random.split(key, 3)

    # Small, module-consistent shapes: batch=2, NCHW input (2, 3, 32, 32).
    B = 2
    x = jax.random.normal(kx, (B, 3, 32, 32), dtype=jnp.float32)

    # Deterministic init mimicking nn.Linear default (uniform +/- 1/sqrt(fan_in)).
    bound = 1.0 / (IN_FEATURES ** 0.5)
    weight = jax.random.uniform(
        kw, (OUT_FEATURES, IN_FEATURES), minval=-bound, maxval=bound,
        dtype=jnp.float32)
    bias = jax.random.uniform(
        kb, (OUT_FEATURES,), minval=-bound, maxval=bound, dtype=jnp.float32)

    out = firstnet_forward(x, weight, bias)
    out = jax.block_until_ready(out)

    # Reference of the PyTorch forward (f32). Kernel uses bf16 inputs with f32
    # accumulation, so allow bf16-level tolerance.
    ref = x.reshape(B, IN_FEATURES) @ weight.T + bias
    assert out.shape == (B, OUT_FEATURES)
    assert jnp.allclose(out, ref, atol=2e-2, rtol=2e-2)

    print("KERNEL_OK")
</pallas_src>

<mosaic_0001>
module attributes {stable_mosaic.version = 11 : i64} {
  func.func @_linear_kernel(%arg0: i32, %arg1: memref<8x3072xbf16, #tpu.memory_space<vmem>>, %arg2: memref<128x3072xbf16, #tpu.memory_space<vmem>>, %arg3: memref<1x128xf32, #tpu.memory_space<vmem>>, %arg4: memref<8x128xf32, #tpu.memory_space<vmem>>) attributes {dimension_semantics = [#tpu.dimension_semantics<parallel>], iteration_bounds = array<i64: 1>, scalar_prefetch = 0 : i64, scratch_operands = 0 : i64, tpu.core_type = #tpu.core_type<tc>, window_params = [{transform_indices = @transform_0, window_bounds = array<i64: 8, 3072>}, {pipeline_mode = #tpu.pipeline_mode<synchronous>, transform_indices = @transform_1, window_bounds = array<i64: 128, 3072>}, {pipeline_mode = #tpu.pipeline_mode<synchronous>, transform_indices = @transform_2, window_bounds = array<i64: 1, 128>}, {transform_indices = @transform_3, window_bounds = array<i64: 8, 128>}]} {
    %c0 = arith.constant 0 : index
    %c0_0 = arith.constant 0 : index
    %0 = vector.load %arg1[%c0, %c0_0] : memref<8x3072xbf16, #tpu.memory_space<vmem>>, vector<8x3072xbf16>
    %c0_1 = arith.constant 0 : index
    %c0_2 = arith.constant 0 : index
    %1 = vector.load %arg2[%c0_1, %c0_2] : memref<128x3072xbf16, #tpu.memory_space<vmem>>, vector<128x3072xbf16>
    %cst = arith.constant dense<0.000000e+00> : vector<8x128xf32>
    %2 = tpu.matmul %0, %1, %cst {dimension_numbers = #tpu.dot_dimension_numbers<[1], [1], [0], [0], [0, 0, 1, 0], [], []>} : vector<8x3072xbf16>, vector<128x3072xbf16>, vector<8x128xf32> -> vector<8x128xf32>
    %c0_3 = arith.constant 0 : index
    %c0_4 = arith.constant 0 : index
    %3 = vector.load %arg3[%c0_3, %c0_4] : memref<1x128xf32, #tpu.memory_space<vmem>>, vector<1x128xf32>
    %4 = vector.broadcast %3 : vector<1x128xf32> to vector<8x128xf32>
    %5 = arith.addf %2, %4 : vector<8x128xf32>
    %c0_5 = arith.constant 0 : index
    %c0_6 = arith.constant 0 : index
    %6 = vector.load %arg4[%c0_5, %c0_6] : memref<8x128xf32, #tpu.memory_space<vmem>>, vector<8x128xf32>
    tpu.vector_store %arg4[%c0_5, %c0_6], %5 {strides = array<i32>} : memref<8x128xf32, #tpu.memory_space<vmem>>, vector<8x128xf32>,
    return
  }
  func.func @transform_0(%arg0: i32) -> (i32, i32) {
    %c0_i32 = arith.constant 0 : i32
    %c0_i32_0 = arith.constant 0 : i32
    return %arg0, %c0_i32 : i32, i32
  }
  func.func @transform_1(%arg0: i32) -> (i32, i32) {
    %c0_i32 = arith.constant 0 : i32
    %c0_i32_0 = arith.constant 0 : i32
    %c0_i32_1 = arith.constant 0 : i32
    return %c0_i32, %c0_i32_0 : i32, i32
  }
  func.func @transform_2(%arg0: i32) -> (i32, i32) {
    %c0_i32 = arith.constant 0 : i32
    %c0_i32_0 = arith.constant 0 : i32
    %c0_i32_1 = arith.constant 0 : i32
    return %c0_i32, %c0_i32_0 : i32, i32
  }
  func.func @transform_3(%arg0: i32) -> (i32, i32) {
    %c0_i32 = arith.constant 0 : i32
    %c0_i32_0 = arith.constant 0 : i32
    return %arg0, %c0_i32 : i32, i32
  }
}

</mosaic_0001>

<bundles_post_ra>
// kernel: firstnet_forward.1
= control target key start
LH: loop header
LB: loop body
LE: loop exit
PB: predicated region body
PF: predicated region fallthrough
CT: control target
= control target key end

     0   :  { %s3767_s1 = inlined_call_operand.vmem [shape: bf16[128,3072], index: 1, kind: input, shape index: {}]   ;;  %s3768_s0 = inlined_call_operand.vmem [shape: bf16[8,3072], index: 0, kind: input, shape index: {}]   ;;  %s3769_s2 = inlined_call_operand.vmem [shape: f32[1,128], index: 2, kind: input, shape index: {}]   ;;  %s3770_s3 = inlined_call_operand.vmem [shape: f32[8,128], index: 3, kind: output, shape index: {}]  }
   0x1   :  { %v2257_v0 = vld [vmem:[%s3767_s1 + $0x540] sm:$0xf]  ;;  %v2519_v2 = vld [vmem:[%s3767_s1 + $0x544] sm:$0xf]  ;;  %v2265_v5 = vld [vmem:[%s3767_s1 + $0x548] sm:$0xf] }
   0x2   :  { %v2531_v1 = vld [vmem:[%s3767_s1 + $0x59c] sm:$0xf0]  ;;  %v2259_v4 = vld [vmem:[%s3767_s1 + $0x5a0] sm:$0xf0]  ;;  %v2532_v6 = vld [vmem:[%s3767_s1 + $0x5a4] sm:$0xf0] }
   0x3   :  { %v2258_v3 = vor.u32 %v2531_v1, %v2257_v0  ;;  %v2262_v7 = vor.u32 %v2519_v2, %v2259_v4  ;;  %v2266_v8 = vor.u32 %v2532_v6, %v2265_v5  ;;  %v2520_v9 = vld [vmem:[%s3767_s1 + $0x54c] sm:$0xf]  ;;  %v2161_v12 = vld [vmem:[%s3767_s1 + $0x480] sm:$0xf]  ;;  %v2495_v14 = vld [vmem:[%s3767_s1 + $0x484] sm:$0xf] }
   0x4   :  { %v2267_v10 = vld [vmem:[%s3767_s1 + $0x5a8] sm:$0xf0]  ;;  %v2507_v13 = vld [vmem:[%s3767_s1 + $0x4dc] sm:$0xf0]  ;;  %v2163_v15 = vld [vmem:[%s3767_s1 + $0x4e0] sm:$0xf0] }
   0x5   :  { %1266 = vmatpush.bf16.xpose.msra.mxu0 %v2258_v3  ;;  %v2270_v11 = vor.u32 %v2520_v9, %v2267_v10  ;;  %1279 = vmatpush.bf16.xpose.msra.mxu1 %v2262_v7  ;;  %v2169_v16 = vld [vmem:[%s3767_s1 + $0x488] sm:$0xf]  ;;  %v2496_v18 = vld [vmem:[%s3767_s1 + $0x48c] sm:$0xf]  ;;  %v2162_v20 = vor.u32 %v2507_v13, %v2161_v12  ;;  %v2166_v21 = vor.u32 %v2495_v14, %v2163_v15  ;;  %v2065_v24 = vld [vmem:[%s3767_s1 + $0x3c0] sm:$0xf] }
   0x6   :  { %1292 = vmatpush.bf16.xpose.msra.mxu2 %v2266_v8  ;;  %v2508_v17 = vld [vmem:[%s3767_s1 + $0x4e4] sm:$0xf0]  ;;  %v2171_v19 = vld [vmem:[%s3767_s1 + $0x4e8] sm:$0xf0]  ;;  %v2483_v25 = vld [vmem:[%s3767_s1 + $0x41c] sm:$0xf0] }
   0x7   :  { %1305 = vmatpush.bf16.xpose.msra.mxu3 %v2270_v11  ;;  %v2170_v22 = vor.u32 %v2508_v17, %v2169_v16  ;;  %v2174_v23 = vor.u32 %v2496_v18, %v2171_v19  ;;  %v2471_v26 = vld [vmem:[%s3767_s1 + $0x3c4] sm:$0xf]  ;;  %v2073_v28 = vld [vmem:[%s3767_s1 + $0x3c8] sm:$0xf]  ;;  %v2472_v30 = vld [vmem:[%s3767_s1 + $0x3cc] sm:$0xf]  ;;  %v2066_v32 = vor.u32 %v2483_v25, %v2065_v24 }
   0x8   :  { %v2067_v27 = vld [vmem:[%s3767_s1 + $0x420] sm:$0xf0]  ;;  %v2484_v29 = vld [vmem:[%s3767_s1 + $0x424] sm:$0xf0]  ;;  %v2075_v31 = vld [vmem:[%s3767_s1 + $0x428] sm:$0xf0] }
   0x9   :  { %v2070_v33 = vor.u32 %v2471_v26, %v2067_v27  ;;  %v2074_v34 = vor.u32 %v2484_v29, %v2073_v28  ;;  %v2078_v35 = vor.u32 %v2472_v30, %v2075_v31  ;;  %v1969_v36 = vld [vmem:[%s3767_s1 + $0x300] sm:$0xf]  ;;  %v2447_v38 = vld [vmem:[%s3767_s1 + $0x304] sm:$0xf]  ;;  %v1977_v40 = vld [vmem:[%s3767_s1 + $0x308] sm:$0xf] }
   0xa   :  { %v2459_v37 = vld [vmem:[%s3767_s1 + $0x35c] sm:$0xf0]  ;;  %v1971_v39 = vld [vmem:[%s3767_s1 + $0x360] sm:$0xf0]  ;;  %v2460_v41 = vld [vmem:[%s3767_s1 + $0x364] sm:$0xf0] }
   0xb   :  { %v2448_v42 = vld [vmem:[%s3767_s1 + $0x30c] sm:$0xf]  ;;  %v1970_v44 = vor.u32 %v2459_v37, %v1969_v36  ;;  %v1974_v45 = vor.u32 %v2447_v38, %v1971_v39  ;;  %v1978_v46 = vor.u32 %v2460_v41, %v1977_v40  ;;  %v1873_v48 = vld [vmem:[%s3767_s1 + $0x240] sm:$0xf]  ;;  %v2423_v50 = vld [vmem:[%s3767_s1 + $0x244] sm:$0xf] }
   0xc   :  { %v1979_v43 = vld [vmem:[%s3767_s1 + $0x368] sm:$0xf0]  ;;  %v2435_v49 = vld [vmem:[%s3767_s1 + $0x29c] sm:$0xf0]  ;;  %v1875_v51 = vld [vmem:[%s3767_s1 + $0x2a0] sm:$0xf0] }
   0xd   :  { %1267 = vmatpush.bf16.xpose.msra.mxu0 %v2162_v20  ;;  %1280 = vmatpush.bf16.xpose.msra.mxu1 %v2166_v21  ;;  %v1982_v47 = vor.u32 %v2448_v42, %v1979_v43  ;;  %v1881_v52 = vld [vmem:[%s3767_s1 + $0x248] sm:$0xf]  ;;  %v2424_v54 = vld [vmem:[%s3767_s1 + $0x24c] sm:$0xf]  ;;  %v1874_v56 = vor.u32 %v2435_v49, %v1873_v48  ;;  %v1878_v57 = vor.u32 %v2423_v50, %v1875_v51  ;;  %v1777_v60 = vld [vmem:[%s3767_s1 + $0x180] sm:$0xf] }
   0xe   :  { %1293 = vmatpush.bf16.xpose.msra.mxu2 %v2170_v22  ;;  %v2436_v53 = vld [vmem:[%s3767_s1 + $0x2a4] sm:$0xf0]  ;;  %v1883_v55 = vld [vmem:[%s3767_s1 + $0x2a8] sm:$0xf0]  ;;  %v2411_v61 = vld [vmem:[%s3767_s1 + $0x1dc] sm:$0xf0] }
   0xf   :  { %1306 = vmatpush.bf16.xpose.msra.mxu3 %v2174_v23  ;;  %v1882_v58 = vor.u32 %v2436_v53, %v1881_v52  ;;  %v1886_v59 = vor.u32 %v2424_v54, %v1883_v55  ;;  %v2399_v62 = vld [vmem:[%s3767_s1 + $0x184] sm:$0xf]  ;;  %v1785_v0 = vld [vmem:[%s3767_s1 + $0x188] sm:$0xf]  ;;  %v2400_v2 = vld [vmem:[%s3767_s1 + $0x18c] sm:$0xf]  ;;  %v1778_v4 = vor.u32 %v2411_v61, %v1777_v60 }
  0x10   :  { %v1779_v63 = vld [vmem:[%s3767_s1 + $0x1e0] sm:$0xf0]  ;;  %v2412_v1 = vld [vmem:[%s3767_s1 + $0x1e4] sm:$0xf0]  ;;  %v1787_v3 = vld [vmem:[%s3767_s1 + $0x1e8] sm:$0xf0] }
  0x11   :  { %v1782_v5 = vor.u32 %v2399_v62, %v1779_v63  ;;  %v1786_v6 = vor.u32 %v2412_v1, %v1785_v0  ;;  %v1790_v7 = vor.u32 %v2400_v2, %v1787_v3  ;;  %v1681_v8 = vld [vmem:[%s3767_s1 + $0xc0] sm:$0xf]  ;;  %v2375_v10 = vld [vmem:[%s3767_s1 + $0xc4] sm:$0xf]  ;;  %v1689_v12 = vld [vmem:[%s3767_s1 + $0xc8] sm:$0xf] }
  0x12   :  { %v2387_v9 = vld [vmem:[%s3767_s1 + $0x11c] sm:$0xf0]  ;;  %v1683_v11 = vld [vmem:[%s3767_s1 + $0x120] sm:$0xf0]  ;;  %v2388_v13 = vld [vmem:[%s3767_s1 + $0x124] sm:$0xf0] }
  0x13   :  { %v2376_v14 = vld [vmem:[%s3767_s1 + $0xcc] sm:$0xf]  ;;  %v1682_v16 = vor.u32 %v2387_v9, %v1681_v8  ;;  %v1686_v17 = vor.u32 %v2375_v10, %v1683_v11  ;;  %v1690_v18 = vor.u32 %v2388_v13, %v1689_v12  ;;  %v1585_v20 = vld [vmem:[%s3767_s1] sm:$0xf]  ;;  %v2351_v22 = vld [vmem:[%s3767_s1 + $0x4] sm:$0xf] }
  0x14   :  { %v1691_v15 = vld [vmem:[%s3767_s1 + $0x128] sm:$0xf0]  ;;  %v2363_v21 = vld [vmem:[%s3767_s1 + $0x5c] sm:$0xf0]  ;;  %v1587_v23 = vld [vmem:[%s3767_s1 + $0x60] sm:$0xf0] }
  0x15   :  { %1268 = vmatpush.bf16.xpose.msra.mxu0 %v2066_v32  ;;  %1281 = vmatpush.bf16.xpose.msra.mxu1 %v2070_v33  ;;  %v1694_v19 = vor.u32 %v2376_v14, %v1691_v15  ;;  %v1593_v24 = vld [vmem:[%s3767_s1 + $0x8] sm:$0xf]  ;;  %v2352_v26 = vld [vmem:[%s3767_s1 + $0xc] sm:$0xf]  ;;  %v2273_v28 = vld [vmem:[%s3767_s1 + $0x550] sm:$0xf]  ;;  %v1586_v31 = vor.u32 %v2363_v21, %v1585_v20 }
  0x16   :  { %1294 = vmatpush.bf16.xpose.msra.mxu2 %v2074_v34  ;;  %v2364_v25 = vld [vmem:[%s3767_s1 + $0x64] sm:$0xf0]  ;;  %v1595_v27 = vld [vmem:[%s3767_s1 + $0x68] sm:$0xf0]  ;;  %v2533_v29 = vld [vmem:[%s3767_s1 + $0x5ac] sm:$0xf0] }
  0x17   :  { %1307 = vmatpush.bf16.xpose.msra.mxu3 %v2078_v35  ;;  %v2521_v30 = vld [vmem:[%s3767_s1 + $0x554] sm:$0xf]  ;;  %v2281_v33 = vld [vmem:[%s3767_s1 + $0x558] sm:$0xf]  ;;  %v1590_v35 = vor.u32 %v2351_v22, %v1587_v23  ;;  %v1594_v36 = vor.u32 %v2364_v25, %v1593_v24  ;;  %v2522_v37 = vld [vmem:[%s3767_s1 + $0x55c] sm:$0xf]  ;;  %v1598_v39 = vor.u32 %v2352_v26, %v1595_v27  ;;  %v2274_v40 = vor.u32 %v2533_v29, %v2273_v28 }
  0x18   :  { %v2275_v32 = vld [vmem:[%s3767_s1 + $0x5b0] sm:$0xf0]  ;;  %v2534_v34 = vld [vmem:[%s3767_s1 + $0x5b4] sm:$0xf0]  ;;  %v2283_v38 = vld [vmem:[%s3767_s1 + $0x5b8] sm:$0xf0] }
  0x19   :  { %v2278_v41 = vor.u32 %v2521_v30, %v2275_v32  ;;  %v2282_v42 = vor.u32 %v2534_v34, %v2281_v33  ;;  %v2286_v43 = vor.u32 %v2522_v37, %v2283_v38  ;;  %v2185_v48 = vld [vmem:[%s3767_s1 + $0x498] sm:$0xf]  ;;  %v2498_v50 = vld [vmem:[%s3767_s1 + $0x49c] sm:$0xf]  ;;  %v15_v62 = vld [vmem:[%s3768_s0 + $0x8] sm:$0xff] }
  0x1a   :  { %v2510_v49 = vld [vmem:[%s3767_s1 + $0x4f4] sm:$0xf0]  ;;  %v2187_v51 = vld [vmem:[%s3767_s1 + $0x4f8] sm:$0xf0]  ;;  %v236_v1 = vunpack.c.l.b16 %v15_v62  ;;  %v237_v9 = vunpack.c.h.b16 %v15_v62  ;;  %v1985_v10 = vld [vmem:[%s3767_s1 + $0x310] sm:$0xf] }
  0x1b   :  { %v2186_v54 = vor.u32 %v2510_v49, %v2185_v48  ;;  %v2190_v55 = vor.u32 %v2498_v50, %v2187_v51  ;;  %v2089_v60 = vld [vmem:[%s3767_s1 + $0x3d8] sm:$0xf]  ;;  %v2474_v63 = vld [vmem:[%s3767_s1 + $0x3dc] sm:$0xf]  ;;  %v2461_v11 = vld [vmem:[%s3767_s1 + $0x36c] sm:$0xf0] }
  0x1c   :  { %v2486_v61 = vld [vmem:[%s3767_s1 + $0x434] sm:$0xf0]  ;;  %v2091_v0 = vld [vmem:[%s3767_s1 + $0x438] sm:$0xf0]  ;;  %v2449_v12 = vld [vmem:[%s3767_s1 + $0x314] sm:$0xf]  ;;  %v1986_v22 = vor.u32 %v2461_v11, %v1985_v10 }
  0x1d   :  { %1269 = vmatpush.bf16.xpose.msra.mxu0 %v1970_v44  ;;  %1282 = vmatpush.bf16.xpose.msra.mxu1 %v1974_v45  ;;  %v2177_v44 = vld [vmem:[%s3767_s1 + $0x490] sm:$0xf]  ;;  %v1987_v15 = vld [vmem:[%s3767_s1 + $0x370] sm:$0xf0]  ;;  %v1995_v20 = vld [vmem:[%s3767_s1 + $0x378] sm:$0xf0] }
  0x1e   :  { %1295 = vmatpush.bf16.xpose.msra.mxu2 %v1978_v46  ;;  %v2509_v45 = vld [vmem:[%s3767_s1 + $0x4ec] sm:$0xf0]  ;;  %v2497_v46 = vld [vmem:[%s3767_s1 + $0x494] sm:$0xf]  ;;  %v1990_v23 = vor.u32 %v2449_v12, %v1987_v15  ;;  %v1897_v30 = vld [vmem:[%s3767_s1 + $0x258] sm:$0xf] }
  0x1f   :  { %1308 = vmatpush.bf16.xpose.msra.mxu3 %v1982_v47  ;;  %v2179_v47 = vld [vmem:[%s3767_s1 + $0x4f0] sm:$0xf0]  ;;  %v2178_v52 = vor.u32 %v2509_v45, %v2177_v44  ;;  %v1889_v26 = vld [vmem:[%s3767_s1 + $0x250] sm:$0xf]  ;;  %v2426_v32 = vld [vmem:[%s3767_s1 + $0x25c] sm:$0xf] }
  0x20   :  { %v2182_v53 = vor.u32 %v2497_v46, %v2179_v47  ;;  %v2437_v27 = vld [vmem:[%s3767_s1 + $0x2ac] sm:$0xf0]  ;;  %v2425_v28 = vld [vmem:[%s3767_s1 + $0x254] sm:$0xf]  ;;  %v1899_v33 = vld [vmem:[%s3767_s1 + $0x2b8] sm:$0xf0] }
  0x21   :  { %v1891_v29 = vld [vmem:[%s3767_s1 + $0x2b0] sm:$0xf0]  ;;  %v1890_v34 = vor.u32 %v2437_v27, %v1889_v26  ;;  %v1902_v37 = vor.u32 %v2426_v32, %v1899_v33  ;;  %v1793_v38 = vld [vmem:[%s3767_s1 + $0x190] sm:$0xf]  ;;  %v2402_v44 = vld [vmem:[%s3767_s1 + $0x19c] sm:$0xf] }
  0x22   :  { %v1803_v45 = vld [vmem:[%s3767_s1 + $0x1f8] sm:$0xf0]  ;;  %v1697_v50 = vld [vmem:[%s3767_s1 + $0xd0] sm:$0xf]  ;;  %v2297_v11 = vld [vmem:[%s3767_s1 + $0x568] sm:$0xf] }
  0x23   :  { %v1806_v49 = vor.u32 %v2402_v44, %v1803_v45  ;;  %v2389_v51 = vld [vmem:[%s3767_s1 + $0x12c] sm:$0xf0]  ;;  %v2536_v12 = vld [vmem:[%s3767_s1 + $0x5c4] sm:$0xf0]  ;;  %v2195_v33 = vld [vmem:[%s3767_s1 + $0x500] sm:$0xf0] }
  0x24   :  { %v1601_v62 = vld [vmem:[%s3767_s1 + $0x10] sm:$0xf]  ;;  %v2097_v44 = vld [vmem:[%s3767_s1 + $0x3e0] sm:$0xf] }
  0x25   :  { %1270 = vmatpush.bf16.xpose.msra.mxu0 %v1874_v56  ;;  %1283 = vmatpush.bf16.xpose.msra.mxu1 %v1878_v57  ;;  %v2081_v56 = vld [vmem:[%s3767_s1 + $0x3d0] sm:$0xf]  ;;  %v2487_v45 = vld [vmem:[%s3767_s1 + $0x43c] sm:$0xf0] }
  0x26   :  { %1296 = vmatpush.bf16.xpose.msra.mxu2 %v1882_v58  ;;  %v2485_v57 = vld [vmem:[%s3767_s1 + $0x42c] sm:$0xf0]  ;;  %v2473_v58 = vld [vmem:[%s3767_s1 + $0x3d4] sm:$0xf] }
  0x27   :  { %1309 = vmatpush.bf16.xpose.msra.mxu3 %v1886_v59  ;;  %v2083_v59 = vld [vmem:[%s3767_s1 + $0x430] sm:$0xf0]  ;;  %v2082_v2 = vor.u32 %v2485_v57, %v2081_v56  ;;  %v2378_v56 = vld [vmem:[%s3767_s1 + $0xdc] sm:$0xf] }
  0x28   :  { %v2086_v3 = vor.u32 %v2473_v58, %v2083_v59  ;;  %v1707_v57 = vld [vmem:[%s3767_s1 + $0x138] sm:$0xf0]  ;;  %v1698_v58 = vor.u32 %v2389_v51, %v1697_v50  ;;  %v2476_v50 = vld [vmem:[%s3767_s1 + $0x3ec] sm:$0xf] }
  0x29   :  { %v2107_v51 = vld [vmem:[%s3767_s1 + $0x448] sm:$0xf0] }
  0x2d   :  { %1271 = vmatpush.bf16.xpose.msra.mxu0 %v1778_v4  ;;  %1284 = vmatpush.bf16.xpose.msra.mxu1 %v1782_v5  ;;  %v2090_v4 = vor.u32 %v2486_v61, %v2089_v60  ;;  %v260_v5 = vpack.c.b16 %v236_v1, %v236_v1  ;;  %v1710_v61 = vor.u32 %v2378_v56, %v1707_v57  ;;  %v1603_v1 = vld [vmem:[%s3767_s1 + $0x70] sm:$0xf0]  ;;  %v2001_v56 = vld [vmem:[%s3767_s1 + $0x320] sm:$0xf] }
  0x2e   :  { %1297 = vmatpush.bf16.xpose.msra.mxu2 %v1786_v6  ;;  %v2094_v6 = vor.u32 %v2474_v63, %v2091_v0  ;;  %v2365_v63 = vld [vmem:[%s3767_s1 + $0x6c] sm:$0xf0]  ;;  %v2353_v0 = vld [vmem:[%s3767_s1 + $0x14] sm:$0xf]  ;;  %v2463_v57 = vld [vmem:[%s3767_s1 + $0x37c] sm:$0xf0] }
  0x2f   :  { %1310 = vmatpush.bf16.xpose.msra.mxu3 %v1790_v7  ;;  %v14_v7 = vld [vmem:[%s3768_s0] sm:$0xff]  ;;  %v1602_v10 = vor.u32 %v2365_v63, %v1601_v62  ;;  %v2452_v62 = vld [vmem:[%s3767_s1 + $0x32c] sm:$0xf] }
  0x30   :  { %v234_v8 = vunpack.c.l.b16 %v14_v7  ;;  %v235_v14 = vunpack.c.h.b16 %v14_v7  ;;  %v2535_v7 = vld [vmem:[%s3767_s1 + $0x5bc] sm:$0xf0]  ;;  %v2011_v63 = vld [vmem:[%s3767_s1 + $0x388] sm:$0xf0] }
  0x32   :  { %v258_v13 = vpack.c.b16 %v234_v8, %v234_v8  ;;  %v259_v21 = vpack.c.b16 %v235_v14, %v235_v14  ;;  %v2523_v8 = vld [vmem:[%s3767_s1 + $0x564] sm:$0xf]  ;;  %v1606_v14 = vor.u32 %v2353_v0, %v1603_v1  ;;  %v2002_v0 = vor.u32 %v2463_v57, %v2001_v56 }
  0x35   :  { %1272 = vmatpush.bf16.xpose.msra.mxu0 %v1682_v16  ;;  %1285 = vmatpush.bf16.xpose.msra.mxu1 %v1686_v17  ;;  %v1993_v16 = vld [vmem:[%s3767_s1 + $0x318] sm:$0xf] }
  0x36   :  { %1298 = vmatpush.bf16.xpose.msra.mxu2 %v1690_v18  ;;  %v2462_v17 = vld [vmem:[%s3767_s1 + $0x374] sm:$0xf0]  ;;  %v261_v18 = vpack.c.b16 %v237_v9, %v237_v9  ;;  %v2291_v9 = vld [vmem:[%s3767_s1 + $0x5c0] sm:$0xf0] }
  0x37   :  { %1311 = vmatpush.bf16.xpose.msra.mxu3 %v1694_v19  ;;  %v2450_v19 = vld [vmem:[%s3767_s1 + $0x31c] sm:$0xf]  ;;  %v1994_v24 = vor.u32 %v2462_v17, %v1993_v16  ;;  %v2524_v16 = vld [vmem:[%s3767_s1 + $0x56c] sm:$0xf] }
  0x38   :  { %v1998_v25 = vor.u32 %v2450_v19, %v1995_v20  ;;  %v2299_v17 = vld [vmem:[%s3767_s1 + $0x5c8] sm:$0xf0] }
  0x3d   :  { %1273 = vmatpush.bf16.xpose.msra.mxu0 %v1586_v31  ;;  %1286 = vmatpush.bf16.xpose.msra.mxu1 %v1590_v35  ;;  %v2438_v31 = vld [vmem:[%s3767_s1 + $0x2b4] sm:$0xf0]  ;;  %v1894_v35 = vor.u32 %v2425_v28, %v1891_v29  ;;  %v2193_v29 = vld [vmem:[%s3767_s1 + $0x4a0] sm:$0xf] }
  0x3e   :  { %1299 = vmatpush.bf16.xpose.msra.mxu2 %v1594_v36  ;;  %v1898_v36 = vor.u32 %v2438_v31, %v1897_v30  ;;  %v2511_v30 = vld [vmem:[%s3767_s1 + $0x4fc] sm:$0xf0]  ;;  %v2499_v31 = vld [vmem:[%s3767_s1 + $0x4a4] sm:$0xf] }
  0x3f   :  { %1312 = vmatpush.bf16.xpose.msra.mxu3 %v1598_v39  ;;  %v2413_v39 = vld [vmem:[%s3767_s1 + $0x1ec] sm:$0xf0] }
  0x40   :  { %v1794_v46 = vor.u32 %v2413_v39, %v1793_v38  ;;  %v2500_v38 = vld [vmem:[%s3767_s1 + $0x4ac] sm:$0xf] }
  0x41   :  { %v2203_v39 = vld [vmem:[%s3767_s1 + $0x508] sm:$0xf0] }
  0x44   :  { %1274 = vmatmul.bf16.vlgmr.msra.gmra.mxu0 %v258_v13  ;;  %1287 = vmatmul.bf16.vlgmr.msra.gmra.mxu1 %v259_v21  ;;  %v16_v13 = vld [vmem:[%s3768_s0 + $0x10] sm:$0xff]  ;;  %v2294_v21 = vor.u32 %v2523_v8, %v2291_v9  ;;  %v1913_v8 = vld [vmem:[%s3767_s1 + $0x268] sm:$0xf] }
  0x45   :  { %1318 = vmatpush.bf16.xpose.msrb.mxu0 %v2274_v40  ;;  %1331 = vmatpush.bf16.xpose.msrb.mxu1 %v2278_v41  ;;  %v2401_v40 = vld [vmem:[%s3767_s1 + $0x194] sm:$0xf]  ;;  %v239_v26 = vunpack.c.h.b16 %v16_v13  ;;  %v2440_v9 = vld [vmem:[%s3767_s1 + $0x2c4] sm:$0xf0] }
  0x46   :  { %1344 = vmatpush.bf16.xpose.msrb.mxu2 %v2282_v42  ;;  %1313 = vmatmul.bf16.vlgmr.msra.gmra.mxu3 %v261_v18  ;;  %v1795_v41 = vld [vmem:[%s3767_s1 + $0x1f0] sm:$0xf0]  ;;  %v1801_v42 = vld [vmem:[%s3767_s1 + $0x198] sm:$0xf] }
  0x47   :  { %1357 = vmatpush.bf16.xpose.msrb.mxu3 %v2286_v43  ;;  %1300 = vmatmul.bf16.vlgmr.msra.gmra.mxu2 %v260_v5  ;;  %v2414_v43 = vld [vmem:[%s3767_s1 + $0x1f4] sm:$0xf0]  ;;  %v1798_v47 = vor.u32 %v2401_v40, %v1795_v41  ;;  %v1611_v5 = vld [vmem:[%s3767_s1 + $0x78] sm:$0xf0]  ;;  %v2194_v40 = vor.u32 %v2511_v30, %v2193_v29  ;;  %v2198_v41 = vor.u32 %v2499_v31, %v2195_v33  ;;  %v2391_v29 = vld [vmem:[%s3767_s1 + $0x13c] sm:$0xf0] }
  0x48   :  { %v1802_v48 = vor.u32 %v2414_v43, %v1801_v42  ;;  %v17_v18 = vld [vmem:[%s3768_s0 + $0x18] sm:$0xff]  ;;  %v2206_v43 = vor.u32 %v2500_v38, %v2203_v39  ;;  %v2379_v30 = vld [vmem:[%s3767_s1 + $0xe4] sm:$0xf]  ;;  %v2392_v33 = vld [vmem:[%s3767_s1 + $0x144] sm:$0xf0] }
  0x49   :  { %v241_v27 = vunpack.c.h.b16 %v17_v18  ;;  %v1715_v31 = vld [vmem:[%s3767_s1 + $0x140] sm:$0xf0] }
  0x4d   :  { %1319 = vmatpush.bf16.xpose.msrb.mxu0 %v2178_v52  ;;  %1332 = vmatpush.bf16.xpose.msrb.mxu1 %v2182_v53  ;;  %v2377_v52 = vld [vmem:[%s3767_s1 + $0xd4] sm:$0xf] }
  0x4e   :  { %1345 = vmatpush.bf16.xpose.msrb.mxu2 %v2186_v54  ;;  %v1699_v53 = vld [vmem:[%s3767_s1 + $0x130] sm:$0xf0]  ;;  %v1705_v54 = vld [vmem:[%s3767_s1 + $0xd8] sm:$0xf] }
  0x4f   :  { %1358 = vmatpush.bf16.xpose.msrb.mxu3 %v2190_v55  ;;  %v2390_v55 = vld [vmem:[%s3767_s1 + $0x134] sm:$0xf0]  ;;  %v1702_v59 = vor.u32 %v2377_v52, %v1699_v53  ;;  %v2098_v52 = vor.u32 %v2487_v45, %v2097_v44  ;;  %v1625_v44 = vld [vmem:[%s3767_s1 + $0x28] sm:$0xf] }
  0x50   :  { %v1706_v60 = vor.u32 %v2390_v55, %v1705_v54  ;;  %v2110_v55 = vor.u32 %v2476_v50, %v2107_v51  ;;  %v2368_v45 = vld [vmem:[%s3767_s1 + $0x84] sm:$0xf0]  ;;  %v2525_v50 = vld [vmem:[%s3767_s1 + $0x574] sm:$0xf] }
  0x51   :  { %v2307_v51 = vld [vmem:[%s3767_s1 + $0x5d0] sm:$0xf0]  ;;  %v1626_v57 = vor.u32 %v2368_v45, %v1625_v44 }
  0x55   :  { %1320 = vmatpush.bf16.xpose.msrb.mxu0 %v2082_v2  ;;  %1333 = vmatpush.bf16.xpose.msrb.mxu1 %v2086_v3  ;;  %v1609_v2 = vld [vmem:[%s3767_s1 + $0x18] sm:$0xf] }
  0x56   :  { %1346 = vmatpush.bf16.xpose.msrb.mxu2 %v2090_v4  ;;  %v2366_v3 = vld [vmem:[%s3767_s1 + $0x74] sm:$0xf0]  ;;  %v2354_v4 = vld [vmem:[%s3767_s1 + $0x1c] sm:$0xf] }
  0x57   :  { %1359 = vmatpush.bf16.xpose.msrb.mxu3 %v2094_v6  ;;  %v2289_v6 = vld [vmem:[%s3767_s1 + $0x560] sm:$0xf]  ;;  %v1610_v15 = vor.u32 %v2366_v3, %v1609_v2  ;;  %v1614_v19 = vor.u32 %v2354_v4, %v1611_v5  ;;  %v2014_v3 = vor.u32 %v2452_v62, %v2011_v63  ;;  %v2310_v63 = vor.u32 %v2525_v50, %v2307_v51  ;;  %v1929_v50 = vld [vmem:[%s3767_s1 + $0x278] sm:$0xf] }
  0x58   :  { %v2290_v20 = vor.u32 %v2535_v7, %v2289_v6  ;;  %v1905_v4 = vld [vmem:[%s3767_s1 + $0x260] sm:$0xf]  ;;  %v2427_v6 = vld [vmem:[%s3767_s1 + $0x264] sm:$0xf]  ;;  %v2442_v51 = vld [vmem:[%s3767_s1 + $0x2d4] sm:$0xf0] }
  0x59   :  { %v2439_v5 = vld [vmem:[%s3767_s1 + $0x2bc] sm:$0xf0]  ;;  %v1907_v7 = vld [vmem:[%s3767_s1 + $0x2c0] sm:$0xf0] }
  0x5d   :  { %1321 = vmatpush.bf16.xpose.msrb.mxu0 %v1986_v22  ;;  %1334 = vmatpush.bf16.xpose.msrb.mxu1 %v1990_v23  ;;  %v2298_v22 = vor.u32 %v2536_v12, %v2297_v11  ;;  %v238_v23 = vunpack.c.l.b16 %v16_v13  ;;  %v1915_v11 = vld [vmem:[%s3767_s1 + $0x2c8] sm:$0xf0]  ;;  %v1906_v12 = vor.u32 %v2439_v5, %v1905_v4  ;;  %v1910_v13 = vor.u32 %v2427_v6, %v1907_v7  ;;  %v2209_v7 = vld [vmem:[%s3767_s1 + $0x4b0] sm:$0xf] }
  0x5e   :  { %1347 = vmatpush.bf16.xpose.msrb.mxu2 %v1994_v24  ;;  %v2302_v24 = vor.u32 %v2524_v16, %v2299_v17  ;;  %v1809_v16 = vld [vmem:[%s3767_s1 + $0x1a0] sm:$0xf] }
  0x5f   :  { %1360 = vmatpush.bf16.xpose.msrb.mxu3 %v1998_v25  ;;  %v240_v25 = vunpack.c.l.b16 %v17_v18  ;;  %v262_v28 = vpack.c.b16 %v238_v23, %v238_v23  ;;  %v2415_v17 = vld [vmem:[%s3767_s1 + $0x1fc] sm:$0xf0]  ;;  %v2403_v18 = vld [vmem:[%s3767_s1 + $0x1a4] sm:$0xf]  ;;  %v1819_v23 = vld [vmem:[%s3767_s1 + $0x208] sm:$0xf0] }
  0x61   :  { %v264_v32 = vpack.c.b16 %v240_v25, %v240_v25 }
  0x65   :  { %1322 = vmatpush.bf16.xpose.msrb.mxu0 %v1890_v34  ;;  %1335 = vmatpush.bf16.xpose.msrb.mxu1 %v1894_v35  ;;  %v2201_v34 = vld [vmem:[%s3767_s1 + $0x4a8] sm:$0xf] }
  0x66   :  { %1348 = vmatpush.bf16.xpose.msrb.mxu2 %v1898_v36  ;;  %v2512_v35 = vld [vmem:[%s3767_s1 + $0x504] sm:$0xf0]  ;;  %v263_v36 = vpack.c.b16 %v239_v26, %v239_v26 }
  0x67   :  { %1361 = vmatpush.bf16.xpose.msrb.mxu3 %v1902_v37  ;;  %v265_v37 = vpack.c.b16 %v241_v27, %v241_v27  ;;  %v2202_v42 = vor.u32 %v2512_v35, %v2201_v34  ;;  %v2380_v34 = vld [vmem:[%s3767_s1 + $0xec] sm:$0xf] }
  0x68   :  { %v1723_v35 = vld [vmem:[%s3767_s1 + $0x148] sm:$0xf0] }
  0x69   :  { %v1726_v39 = vor.u32 %v2380_v34, %v1723_v35  ;;  %v2017_v34 = vld [vmem:[%s3767_s1 + $0x330] sm:$0xf] }
  0x6a   :  { %v2465_v35 = vld [vmem:[%s3767_s1 + $0x38c] sm:$0xf0] }
  0x6d   :  { %1323 = vmatpush.bf16.xpose.msrb.mxu0 %v1794_v46  ;;  %1336 = vmatpush.bf16.xpose.msrb.mxu1 %v1798_v47  ;;  %v2475_v46 = vld [vmem:[%s3767_s1 + $0x3e4] sm:$0xf] }
  0x6e   :  { %1349 = vmatpush.bf16.xpose.msrb.mxu2 %v1802_v48  ;;  %v2099_v47 = vld [vmem:[%s3767_s1 + $0x440] sm:$0xf0]  ;;  %v2105_v48 = vld [vmem:[%s3767_s1 + $0x3e8] sm:$0xf] }
  0x6f   :  { %1362 = vmatpush.bf16.xpose.msrb.mxu3 %v1806_v49  ;;  %v2488_v49 = vld [vmem:[%s3767_s1 + $0x444] sm:$0xf0]  ;;  %v2102_v53 = vor.u32 %v2475_v46, %v2099_v47  ;;  %v2356_v46 = vld [vmem:[%s3767_s1 + $0x2c] sm:$0xf] }
  0x70   :  { %v2106_v54 = vor.u32 %v2488_v49, %v2105_v48  ;;  %v1627_v47 = vld [vmem:[%s3767_s1 + $0x88] sm:$0xf0]  ;;  %v2305_v48 = vld [vmem:[%s3767_s1 + $0x570] sm:$0xf] }
  0x71   :  { %v2537_v49 = vld [vmem:[%s3767_s1 + $0x5cc] sm:$0xf0] }
  0x72   :  { %v2306_v62 = vor.u32 %v2537_v49, %v2305_v48  ;;  %v2429_v48 = vld [vmem:[%s3767_s1 + $0x274] sm:$0xf] }
  0x73   :  { %v1923_v49 = vld [vmem:[%s3767_s1 + $0x2d0] sm:$0xf0] }
  0x75   :  { %1324 = vmatpush.bf16.xpose.msrb.mxu0 %v1698_v58  ;;  %1337 = vmatpush.bf16.xpose.msrb.mxu1 %v1702_v59  ;;  %v2451_v58 = vld [vmem:[%s3767_s1 + $0x324] sm:$0xf] }
  0x76   :  { %1350 = vmatpush.bf16.xpose.msrb.mxu2 %v1706_v60  ;;  %v2003_v59 = vld [vmem:[%s3767_s1 + $0x380] sm:$0xf0]  ;;  %v2009_v60 = vld [vmem:[%s3767_s1 + $0x328] sm:$0xf] }
  0x77   :  { %1363 = vmatpush.bf16.xpose.msrb.mxu3 %v1710_v61  ;;  %v2464_v61 = vld [vmem:[%s3767_s1 + $0x384] sm:$0xf0]  ;;  %v2006_v1 = vor.u32 %v2451_v58, %v2003_v59  ;;  %v2526_v58 = vld [vmem:[%s3767_s1 + $0x57c] sm:$0xf] }
  0x78   :  { %v2010_v2 = vor.u32 %v2464_v61, %v2009_v60  ;;  %v2315_v59 = vld [vmem:[%s3767_s1 + $0x5d8] sm:$0xf0]  ;;  %v19_v60 = vld [vmem:[%s3768_s0 + $0x28] sm:$0xff]  ;;  %v1630_v61 = vor.u32 %v2356_v46, %v1627_v47  ;;  %v1921_v46 = vld [vmem:[%s3767_s1 + $0x270] sm:$0xf] }
  0x79   :  { %v245_v5 = vunpack.c.h.b16 %v19_v60  ;;  %v2441_v47 = vld [vmem:[%s3767_s1 + $0x2cc] sm:$0xf0] }
  0x7d   :  { %1325 = vmatpush.bf16.xpose.msrb.mxu0 %v1602_v10  ;;  %1338 = vmatpush.bf16.xpose.msrb.mxu1 %v1606_v14  ;;  %v2428_v10 = vld [vmem:[%s3767_s1 + $0x26c] sm:$0xf]  ;;  %v1914_v14 = vor.u32 %v2440_v9, %v1913_v8  ;;  %v2513_v8 = vld [vmem:[%s3767_s1 + $0x50c] sm:$0xf0]  ;;  %v2501_v9 = vld [vmem:[%s3767_s1 + $0x4b4] sm:$0xf] }
  0x7e   :  { %1351 = vmatpush.bf16.xpose.msrb.mxu2 %v1610_v15  ;;  %v1918_v15 = vor.u32 %v2428_v10, %v1915_v11 }
  0x7f   :  { %1364 = vmatpush.bf16.xpose.msrb.mxu3 %v1614_v19  ;;  %v1811_v19 = vld [vmem:[%s3767_s1 + $0x200] sm:$0xf0] }
  0x80   :  { %v1814_v25 = vor.u32 %v2403_v18, %v1811_v19  ;;  %v2210_v18 = vor.u32 %v2513_v8, %v2209_v7  ;;  %v2406_v7 = vld [vmem:[%s3767_s1 + $0x1bc] sm:$0xf] }
  0x81   :  { %v1835_v8 = vld [vmem:[%s3767_s1 + $0x218] sm:$0xf0] }
  0x84   :  { %1326 = vmatmul.bf16.vlgmr.msrb.gmra.mxu0 %v262_v28  ;;  %1339 = vmatmul.bf16.vlgmr.msrb.gmra.mxu1 %v263_v36  ;;  %v1713_v28 = vld [vmem:[%s3767_s1 + $0xe0] sm:$0xf] }
  0x85   :  { %1370 = vmatpush.bf16.xpose.msra.mxu0 %v2290_v20  ;;  %1383 = vmatpush.bf16.xpose.msra.mxu1 %v2294_v21  ;;  %v1817_v20 = vld [vmem:[%s3767_s1 + $0x1a8] sm:$0xf]  ;;  %v1714_v36 = vor.u32 %v2391_v29, %v1713_v28  ;;  %v2478_v28 = vld [vmem:[%s3767_s1 + $0x3fc] sm:$0xf] }
  0x86   :  { %1396 = vmatpush.bf16.xpose.msra.mxu2 %v2298_v22  ;;  %1365 = vmatmul.bf16.vlgmr.msrb.gmra.mxu3 %v265_v37  ;;  %v2416_v21 = vld [vmem:[%s3767_s1 + $0x204] sm:$0xf0]  ;;  %v2404_v22 = vld [vmem:[%s3767_s1 + $0x1ac] sm:$0xf]  ;;  %v1718_v37 = vor.u32 %v2379_v30, %v1715_v31  ;;  %v2123_v29 = vld [vmem:[%s3767_s1 + $0x458] sm:$0xf0] }
  0x87   :  { %1409 = vmatpush.bf16.xpose.msra.mxu3 %v2302_v24  ;;  %1352 = vmatmul.bf16.vlgmr.msrb.gmra.mxu2 %v264_v32  ;;  %v1810_v24 = vor.u32 %v2415_v17, %v1809_v16  ;;  %v1818_v26 = vor.u32 %v2416_v21, %v1817_v20  ;;  %v1822_v27 = vor.u32 %v2404_v22, %v1819_v23  ;;  %v1721_v32 = vld [vmem:[%s3767_s1 + $0xe8] sm:$0xf]  ;;  %v2502_v16 = vld [vmem:[%s3767_s1 + $0x4bc] sm:$0xf]  ;;  %v2113_v22 = vld [vmem:[%s3767_s1 + $0x3f0] sm:$0xf] }
  0x88   :  { %v1722_v38 = vor.u32 %v2392_v33, %v1721_v32  ;;  %v2219_v17 = vld [vmem:[%s3767_s1 + $0x518] sm:$0xf0]  ;;  %v2489_v23 = vld [vmem:[%s3767_s1 + $0x44c] sm:$0xf0]  ;;  %v2126_v33 = vor.u32 %v2478_v28, %v2123_v29 }
  0x89   :  { %v2222_v21 = vor.u32 %v2502_v16, %v2219_v17  ;;  %v2114_v30 = vor.u32 %v2489_v23, %v2113_v22  ;;  %v1737_v22 = vld [vmem:[%s3767_s1 + $0xf8] sm:$0xf] }
  0x8a   :  { %v2394_v23 = vld [vmem:[%s3767_s1 + $0x154] sm:$0xf0] }
  0x8b   :  { %v1738_v29 = vor.u32 %v2394_v23, %v1737_v22 }
  0x8d   :  { %1371 = vmatpush.bf16.xpose.msra.mxu0 %v2194_v40  ;;  %1384 = vmatpush.bf16.xpose.msra.mxu1 %v2198_v41  ;;  %v1617_v40 = vld [vmem:[%s3767_s1 + $0x20] sm:$0xf] }
  0x8e   :  { %1397 = vmatpush.bf16.xpose.msra.mxu2 %v2202_v42  ;;  %v2367_v41 = vld [vmem:[%s3767_s1 + $0x7c] sm:$0xf0]  ;;  %v2355_v42 = vld [vmem:[%s3767_s1 + $0x24] sm:$0xf] }
  0x8f   :  { %1410 = vmatpush.bf16.xpose.msra.mxu3 %v2206_v43  ;;  %v1619_v43 = vld [vmem:[%s3767_s1 + $0x80] sm:$0xf0] }
  0x90   :  { %v1622_v56 = vor.u32 %v2355_v42, %v1619_v43  ;;  %v2018_v42 = vor.u32 %v2465_v35, %v2017_v34  ;;  %v1635_v34 = vld [vmem:[%s3767_s1 + $0x90] sm:$0xf0]  ;;  %v1641_v35 = vld [vmem:[%s3767_s1 + $0x38] sm:$0xf] }
  0x95   :  { %1372 = vmatpush.bf16.xpose.msra.mxu0 %v2098_v52  ;;  %1385 = vmatpush.bf16.xpose.msra.mxu1 %v2102_v53  ;;  %v1618_v52 = vor.u32 %v2367_v41, %v1617_v40  ;;  %v2313_v53 = vld [vmem:[%s3767_s1 + $0x578] sm:$0xf]  ;;  %v2454_v40 = vld [vmem:[%s3767_s1 + $0x33c] sm:$0xf] }
  0x96   :  { %1398 = vmatpush.bf16.xpose.msra.mxu2 %v2106_v54  ;;  %v2538_v54 = vld [vmem:[%s3767_s1 + $0x5d4] sm:$0xf0]  ;;  %v2027_v41 = vld [vmem:[%s3767_s1 + $0x398] sm:$0xf0] }
  0x97   :  { %1411 = vmatpush.bf16.xpose.msra.mxu3 %v2110_v55  ;;  %v18_v55 = vld [vmem:[%s3768_s0 + $0x20] sm:$0xff]  ;;  %v2030_v45 = vor.u32 %v2454_v40, %v2027_v41 }
  0x98   :  { %v243_v4 = vunpack.c.h.b16 %v18_v55  ;;  %v2539_v40 = vld [vmem:[%s3767_s1 + $0x5dc] sm:$0xf0]  ;;  %v2527_v41 = vld [vmem:[%s3767_s1 + $0x584] sm:$0xf] }
  0x9a   :  { %v267_v11 = vpack.c.b16 %v243_v4, %v243_v4  ;;  %v1833_v4 = vld [vmem:[%s3767_s1 + $0x1b8] sm:$0xf] }
  0x9d   :  { %1373 = vmatpush.bf16.xpose.msra.mxu0 %v2002_v0  ;;  %1386 = vmatpush.bf16.xpose.msra.mxu1 %v2006_v1  ;;  %v2314_v0 = vor.u32 %v2538_v54, %v2313_v53  ;;  %v242_v1 = vunpack.c.l.b16 %v18_v55  ;;  %v1931_v53 = vld [vmem:[%s3767_s1 + $0x2d8] sm:$0xf0]  ;;  %v1922_v54 = vor.u32 %v2441_v47, %v1921_v46  ;;  %v2543_v55 = vld [vmem:[%s3769_s2] ss:$0 sm:$0xff]  ;;  %v20_v46 = vld [vmem:[%s3768_s0 + $0x30] sm:$0xff] }
  0x9e   :  { %1399 = vmatpush.bf16.xpose.msra.mxu2 %v2010_v2  ;;  %v2318_v2 = vor.u32 %v2526_v58, %v2315_v59  ;;  %v1930_v58 = vor.u32 %v2442_v51, %v1929_v50  ;;  %v2331_v50 = vld [vmem:[%s3767_s1 + $0x5e8] sm:$0xf0]  ;;  %v21_v51 = vld [vmem:[%s3768_s0 + $0x38] sm:$0xff] }
  0x9f   :  { %1412 = vmatpush.bf16.xpose.msra.mxu3 %v2014_v3  ;;  %v244_v3 = vunpack.c.l.b16 %v19_v60  ;;  %v266_v6 = vpack.c.b16 %v242_v1, %v242_v1  ;;  %v2417_v1 = vld [vmem:[%s3767_s1 + $0x20c] sm:$0xf0] }
  0xa1   :  { %v268_v10 = vpack.c.b16 %v244_v3, %v244_v3  ;;  %v1827_v3 = vld [vmem:[%s3767_s1 + $0x210] sm:$0xf0] }
  0xa5   :  { %1374 = vmatpush.bf16.xpose.msra.mxu0 %v1906_v12  ;;  %1387 = vmatpush.bf16.xpose.msra.mxu1 %v1910_v13  ;;  %v2211_v12 = vld [vmem:[%s3767_s1 + $0x510] sm:$0xf0]  ;;  %v2217_v13 = vld [vmem:[%s3767_s1 + $0x4b8] sm:$0xf] }
  0xa6   :  { %1400 = vmatpush.bf16.xpose.msra.mxu2 %v1914_v14  ;;  %v2514_v14 = vld [vmem:[%s3767_s1 + $0x514] sm:$0xf0]  ;;  %v2214_v19 = vor.u32 %v2501_v9, %v2211_v12 }
  0xa7   :  { %1413 = vmatpush.bf16.xpose.msra.mxu3 %v1918_v15  ;;  %v269_v15 = vpack.c.b16 %v245_v5, %v245_v5  ;;  %v2218_v20 = vor.u32 %v2514_v14, %v2217_v13  ;;  %v2418_v5 = vld [vmem:[%s3767_s1 + $0x214] sm:$0xf0] }
  0xa8   :  { %v1834_v13 = vor.u32 %v2418_v5, %v1833_v4  ;;  %v2233_v4 = vld [vmem:[%s3767_s1 + $0x4c8] sm:$0xf] }
  0xa9   :  { %v2516_v5 = vld [vmem:[%s3767_s1 + $0x524] sm:$0xf0] }
  0xad   :  { %1375 = vmatpush.bf16.xpose.msra.mxu0 %v1810_v24  ;;  %1388 = vmatpush.bf16.xpose.msra.mxu1 %v1814_v25  ;;  %v2477_v24 = vld [vmem:[%s3767_s1 + $0x3f4] sm:$0xf] }
  0xae   :  { %1401 = vmatpush.bf16.xpose.msra.mxu2 %v1818_v26  ;;  %v2115_v25 = vld [vmem:[%s3767_s1 + $0x450] sm:$0xf0]  ;;  %v2121_v26 = vld [vmem:[%s3767_s1 + $0x3f8] sm:$0xf] }
  0xaf   :  { %1414 = vmatpush.bf16.xpose.msra.mxu3 %v1822_v27  ;;  %v2490_v27 = vld [vmem:[%s3767_s1 + $0x454] sm:$0xf0]  ;;  %v2118_v31 = vor.u32 %v2477_v24, %v2115_v25  ;;  %v2382_v24 = vld [vmem:[%s3767_s1 + $0xfc] sm:$0xf] }
  0xb0   :  { %v2122_v32 = vor.u32 %v2490_v27, %v2121_v26  ;;  %v1739_v25 = vld [vmem:[%s3767_s1 + $0x158] sm:$0xf0] }
  0xb5   :  { %1376 = vmatpush.bf16.xpose.msra.mxu0 %v1714_v36  ;;  %1389 = vmatpush.bf16.xpose.msra.mxu1 %v1718_v37  ;;  %v2453_v36 = vld [vmem:[%s3767_s1 + $0x334] sm:$0xf] }
  0xb6   :  { %1402 = vmatpush.bf16.xpose.msra.mxu2 %v1722_v38  ;;  %v2019_v37 = vld [vmem:[%s3767_s1 + $0x390] sm:$0xf0]  ;;  %v2025_v38 = vld [vmem:[%s3767_s1 + $0x338] sm:$0xf] }
  0xb7   :  { %1415 = vmatpush.bf16.xpose.msra.mxu3 %v1726_v39  ;;  %v2466_v39 = vld [vmem:[%s3767_s1 + $0x394] sm:$0xf0]  ;;  %v2022_v43 = vor.u32 %v2453_v36, %v2019_v37  ;;  %v2358_v37 = vld [vmem:[%s3767_s1 + $0x3c] sm:$0xf] }
  0xb8   :  { %v2026_v44 = vor.u32 %v2466_v39, %v2025_v38  ;;  %v2370_v36 = vld [vmem:[%s3767_s1 + $0x94] sm:$0xf0]  ;;  %v1643_v38 = vld [vmem:[%s3767_s1 + $0x98] sm:$0xf0]  ;;  %v2321_v39 = vld [vmem:[%s3767_s1 + $0x580] sm:$0xf] }
  0xbd   :  { %1377 = vmatpush.bf16.xpose.msra.mxu0 %v1618_v52  ;;  %1390 = vmatpush.bf16.xpose.msra.mxu1 %v1622_v56  ;;  %v2430_v52 = vld [vmem:[%s3767_s1 + $0x27c] sm:$0xf] }
  0xbe   :  { %1403 = vmatpush.bf16.xpose.msra.mxu2 %v1626_v57  ;;  %v1926_v57 = vor.u32 %v2429_v48, %v1923_v49  ;;  %v1934_v59 = vor.u32 %v2430_v52, %v1931_v53  ;;  %v1642_v48 = vor.u32 %v2370_v36, %v1641_v35  ;;  %v2528_v49 = vld [vmem:[%s3767_s1 + $0x58c] sm:$0xf]  ;;  %v1646_v52 = vor.u32 %v2358_v37, %v1643_v38 }
  0xbf   :  { %1416 = vmatpush.bf16.xpose.msra.mxu3 %v1630_v61  ;;  %v2322_v53 = vor.u32 %v2539_v40, %v2321_v39  ;;  %v2456_v35 = vld [vmem:[%s3767_s1 + $0x34c] sm:$0xf] }
  0xc0   :  { %v2043_v36 = vld [vmem:[%s3767_s1 + $0x3a8] sm:$0xf0] }
  0xc1   :  { %v1275_v56 = vpop.f32.mrf.mxu0  ;;  %v1288_v61 = vpop.f32.mrf.mxu1 }
  0xc2   :  { %v1276_v60 = vadd.f32 %v2543_v55, %v1275_v56  ;;  %v246_v56 = vunpack.c.l.b16 %v20_v46 }
  0xc4   :  { %1378 = vmatmul.bf16.vlgmr.msra.gmra.mxu0 %v266_v6  ;;  %1391 = vmatmul.bf16.vlgmr.msra.gmra.mxu1 %v267_v11 }
  0xc5   :  { %1422 = vmatpush.bf16.xpose.msrb.mxu0 %v2306_v62  ;;  %1435 = vmatpush.bf16.xpose.msrb.mxu1 %v2310_v63  ;;  %v1289_v62 = vadd.f32 %v1288_v61, %v1276_v60  ;;  %v249_v60 = vunpack.c.h.b16 %v21_v51  ;;  %v270_v61 = vpack.c.b16 %v246_v56, %v246_v56 }
  0xc6   :  { %1448 = vmatpush.bf16.xpose.msrb.mxu2 %v2314_v0  ;;  %1417 = vmatmul.bf16.vlgmr.msra.gmra.mxu3 %v269_v15  ;;  %v1825_v0 = vld [vmem:[%s3767_s1 + $0x1b0] sm:$0xf]  ;;  %v1838_v15 = vor.u32 %v2406_v7, %v1835_v8  ;;  %v2504_v7 = vld [vmem:[%s3767_s1 + $0x4cc] sm:$0xf] }
  0xc7   :  { %1461 = vmatpush.bf16.xpose.msrb.mxu3 %v2318_v2  ;;  %1404 = vmatmul.bf16.vlgmr.msra.gmra.mxu2 %v268_v10  ;;  %v2405_v2 = vld [vmem:[%s3767_s1 + $0x1b4] sm:$0xf]  ;;  %v1826_v9 = vor.u32 %v2417_v1, %v1825_v0  ;;  %v2503_v0 = vld [vmem:[%s3767_s1 + $0x4c4] sm:$0xf]  ;;  %v2235_v8 = vld [vmem:[%s3767_s1 + $0x528] sm:$0xf0] }
  0xc8   :  { %v1830_v12 = vor.u32 %v2405_v2, %v1827_v3  ;;  %v2227_v3 = vld [vmem:[%s3767_s1 + $0x520] sm:$0xf0] }
  0xc9   :  { %v1314_v10 = vpop.f32.mrf.mxu3  ;;  %v1277_v11 = vpop.f32.mrf.mxu0 }
  0xca   :  { %v1301_v63 = vpop.f32.mrf.mxu2  ;;  %v1290_v16 = vpop.f32.mrf.mxu1  ;;  %v2234_v11 = vor.u32 %v2516_v5, %v2233_v4  ;;  %v1851_v4 = vld [vmem:[%s3767_s1 + $0x228] sm:$0xf0] }
  0xcb   :  { %v1302_v6 = vadd.f32 %v1301_v63, %v1289_v62  ;;  %v2225_v62 = vld [vmem:[%s3767_s1 + $0x4c0] sm:$0xf]  ;;  %v2479_v16 = vld [vmem:[%s3767_s1 + $0x404] sm:$0xf] }
  0xcc   :  { %v2515_v63 = vld [vmem:[%s3767_s1 + $0x51c] sm:$0xf0] }
  0xcd   :  { %1423 = vmatpush.bf16.xpose.msrb.mxu0 %v2210_v18  ;;  %1436 = vmatpush.bf16.xpose.msrb.mxu1 %v2214_v19  ;;  %v3305_v14 = vadd.f32 %v1314_v10, %v1302_v6  ;;  %v1729_v18 = vld [vmem:[%s3767_s1 + $0xf0] sm:$0xf]  ;;  %v273_v6 = vpack.c.b16 %v249_v60, %v249_v60  ;;  %v2230_v10 = vor.u32 %v2503_v0, %v2227_v3  ;;  %v1843_v0 = vld [vmem:[%s3767_s1 + $0x220] sm:$0xf0]  ;;  %v2408_v3 = vld [vmem:[%s3767_s1 + $0x1cc] sm:$0xf] }
  0xce   :  { %1449 = vmatpush.bf16.xpose.msrb.mxu2 %v2218_v20  ;;  %v2393_v19 = vld [vmem:[%s3767_s1 + $0x14c] sm:$0xf0]  ;;  %v2381_v20 = vld [vmem:[%s3767_s1 + $0xf4] sm:$0xf] }
  0xcf   :  { %1462 = vmatpush.bf16.xpose.msrb.mxu3 %v2222_v21  ;;  %v1731_v21 = vld [vmem:[%s3767_s1 + $0x150] sm:$0xf0]  ;;  %v1730_v26 = vor.u32 %v2393_v19, %v1729_v18  ;;  %v2137_v18 = vld [vmem:[%s3767_s1 + $0x408] sm:$0xf] }
  0xd0   :  { %v1734_v28 = vor.u32 %v2381_v20, %v1731_v21  ;;  %v2492_v19 = vld [vmem:[%s3767_s1 + $0x464] sm:$0xf0]  ;;  %v2480_v20 = vld [vmem:[%s3767_s1 + $0x40c] sm:$0xf] }
  0xd1   :  { %v1316_v27 = vpop.f32.mrf.mxu3  ;;  %v2139_v21 = vld [vmem:[%s3767_s1 + $0x468] sm:$0xf0] }
  0xd2   :  { %v1303_v17 = vpop.f32.mrf.mxu2 }
  0xd3   :  { %v2131_v17 = vld [vmem:[%s3767_s1 + $0x460] sm:$0xf0] }
  0xd4   :  { %v2134_v23 = vor.u32 %v2479_v16, %v2131_v17  ;;  %v2384_v16 = vld [vmem:[%s3767_s1 + $0x10c] sm:$0xf] }
  0xd5   :  { %1424 = vmatpush.bf16.xpose.msrb.mxu0 %v2114_v30  ;;  %1437 = vmatpush.bf16.xpose.msrb.mxu1 %v2118_v31  ;;  %v1742_v30 = vor.u32 %v2382_v24, %v1739_v25  ;;  %v1633_v31 = vld [vmem:[%s3767_s1 + $0x30] sm:$0xf]  ;;  %v2138_v24 = vor.u32 %v2492_v19, %v2137_v18  ;;  %v2142_v25 = vor.u32 %v2480_v20, %v2139_v21  ;;  %v1755_v17 = vld [vmem:[%s3767_s1 + $0x168] sm:$0xf0] }
  0xd6   :  { %1450 = vmatpush.bf16.xpose.msrb.mxu2 %v2122_v32  ;;  %v2369_v32 = vld [vmem:[%s3767_s1 + $0x8c] sm:$0xf0]  ;;  %v1758_v21 = vor.u32 %v2384_v16, %v1755_v17 }
  0xd7   :  { %1463 = vmatpush.bf16.xpose.msrb.mxu3 %v2126_v33  ;;  %v2357_v33 = vld [vmem:[%s3767_s1 + $0x34] sm:$0xf] }
  0xd8   :  { %v1638_v47 = vor.u32 %v2357_v33, %v1635_v34  ;;  %v2041_v33 = vld [vmem:[%s3767_s1 + $0x348] sm:$0xf] }
  0xd9   :  { %v2468_v34 = vld [vmem:[%s3767_s1 + $0x3a4] sm:$0xf0] }
  0xda   :  { %v2042_v40 = vor.u32 %v2468_v34, %v2041_v33  ;;  %v2345_v34 = vld [vmem:[%s3767_s1 + $0x598] sm:$0xf] }
  0xdd   :  { %1425 = vmatpush.bf16.xpose.msrb.mxu0 %v2018_v42  ;;  %1438 = vmatpush.bf16.xpose.msrb.mxu1 %v2022_v43  ;;  %v2323_v42 = vld [vmem:[%s3767_s1 + $0x5e0] sm:$0xf0]  ;;  %v1634_v43 = vor.u32 %v2369_v32, %v1633_v31  ;;  %v2467_v31 = vld [vmem:[%s3767_s1 + $0x39c] sm:$0xf0] }
  0xde   :  { %1451 = vmatpush.bf16.xpose.msrb.mxu2 %v2026_v44  ;;  %v2329_v44 = vld [vmem:[%s3767_s1 + $0x588] sm:$0xf]  ;;  %v2455_v32 = vld [vmem:[%s3767_s1 + $0x344] sm:$0xf] }
  0xdf   :  { %1464 = vmatpush.bf16.xpose.msrb.mxu3 %v2030_v45  ;;  %v2540_v45 = vld [vmem:[%s3767_s1 + $0x5e4] sm:$0xf0] }
  0xe0   :  { %v2330_v55 = vor.u32 %v2540_v45, %v2329_v44 }
  0xe5   :  { %1426 = vmatpush.bf16.xpose.msrb.mxu0 %v1922_v54  ;;  %1439 = vmatpush.bf16.xpose.msrb.mxu1 %v1926_v57  ;;  %v2326_v54 = vor.u32 %v2527_v41, %v2323_v42  ;;  %v2334_v57 = vor.u32 %v2528_v49, %v2331_v50  ;;  %v2046_v42 = vor.u32 %v2456_v35, %v2043_v36  ;;  %v2431_v49 = vld [vmem:[%s3767_s1 + $0x284] sm:$0xf]  ;;  %v2542_v35 = vld [vmem:[%s3767_s1 + $0x5f4] sm:$0xf0] }
  0xe6   :  { %1452 = vmatpush.bf16.xpose.msrb.mxu2 %v1930_v58  ;;  %v248_v58 = vunpack.c.l.b16 %v21_v51  ;;  %v1939_v50 = vld [vmem:[%s3767_s1 + $0x2e0] sm:$0xf0]  ;;  %v1945_v51 = vld [vmem:[%s3767_s1 + $0x288] sm:$0xf] }
  0xe7   :  { %1465 = vmatpush.bf16.xpose.msrb.mxu3 %v1934_v59  ;;  %v247_v59 = vunpack.c.h.b16 %v20_v46  ;;  %v1942_v56 = vor.u32 %v2431_v49, %v1939_v50  ;;  %v22_v36 = vld [vmem:[%s3768_s0 + $0x40] sm:$0xff] }
  0xe8   :  { %v272_v1 = vpack.c.b16 %v248_v58, %v248_v58  ;;  %v251_v50 = vunpack.c.h.b16 %v22_v36 }
  0xe9   :  { %v271_v2 = vpack.c.b16 %v247_v59, %v247_v59 }
  0xed   :  { %1427 = vmatpush.bf16.xpose.msrb.mxu0 %v1826_v9  ;;  %1440 = vmatpush.bf16.xpose.msrb.mxu1 %v1830_v12  ;;  %v2226_v9 = vor.u32 %v2515_v63, %v2225_v62  ;;  %v2238_v12 = vor.u32 %v2504_v7, %v2235_v8  ;;  %v2419_v62 = vld [vmem:[%s3767_s1 + $0x21c] sm:$0xf0]  ;;  %v2407_v63 = vld [vmem:[%s3767_s1 + $0x1c4] sm:$0xf]  ;;  %v1854_v8 = vor.u32 %v2408_v3, %v1851_v4  ;;  %v2145_v4 = vld [vmem:[%s3767_s1 + $0x410] sm:$0xf] }
  0xee   :  { %1453 = vmatpush.bf16.xpose.msrb.mxu2 %v1834_v13  ;;  %v2129_v13 = vld [vmem:[%s3767_s1 + $0x400] sm:$0xf] }
  0xef   :  { %1466 = vmatpush.bf16.xpose.msrb.mxu3 %v1838_v15  ;;  %v2491_v15 = vld [vmem:[%s3767_s1 + $0x45c] sm:$0xf0] }
  0xf0   :  { %v2130_v22 = vor.u32 %v2491_v15, %v2129_v13  ;;  %v1753_v13 = vld [vmem:[%s3767_s1 + $0x108] sm:$0xf] }
  0xf1   :  { %v2396_v15 = vld [vmem:[%s3767_s1 + $0x164] sm:$0xf0] }
  0xf2   :  { %v1754_v20 = vor.u32 %v2396_v15, %v1753_v13 }
  0xf5   :  { %1428 = vmatpush.bf16.xpose.msrb.mxu0 %v1730_v26  ;;  %1441 = vmatpush.bf16.xpose.msrb.mxu1 %v1734_v28 }
  0xf6   :  { %1454 = vmatpush.bf16.xpose.msrb.mxu2 %v1738_v29 }
  0xf7   :  { %1467 = vmatpush.bf16.xpose.msrb.mxu3 %v1742_v30  ;;  %v2033_v30 = vld [vmem:[%s3767_s1 + $0x340] sm:$0xf] }
  0xf8   :  { %v2034_v37 = vor.u32 %v2467_v31, %v2033_v30  ;;  %v2337_v30 = vld [vmem:[%s3767_s1 + $0x590] sm:$0xf] }
  0xf9   :  { %v2541_v31 = vld [vmem:[%s3767_s1 + $0x5ec] sm:$0xf0] }
  0xfd   :  { %1429 = vmatpush.bf16.xpose.msrb.mxu0 %v1634_v43  ;;  %1442 = vmatpush.bf16.xpose.msrb.mxu1 %v1638_v47  ;;  %v1937_v47 = vld [vmem:[%s3767_s1 + $0x280] sm:$0xf] }
  0xfe   :  { %1455 = vmatpush.bf16.xpose.msrb.mxu2 %v1642_v48  ;;  %v2443_v48 = vld [vmem:[%s3767_s1 + $0x2dc] sm:$0xf0] }
  0xff   :  { %1468 = vmatpush.bf16.xpose.msrb.mxu3 %v1646_v52  ;;  %v2444_v52 = vld [vmem:[%s3767_s1 + $0x2e4] sm:$0xf0] }
 0x101   :  { %v1327_v26 = vpop.f32.mrf.mxu0  ;;  %v1340_v28 = vpop.f32.mrf.mxu1 }
 0x102   :  { %v1328_v27 = vadd.f32 %v1327_v26, %v3305_v14  ;;  %v2035_v14 = vld [vmem:[%s3767_s1 + $0x3a0] sm:$0xf0]  ;;  %v1657_v26 = vld [vmem:[%s3767_s1 + $0x48] sm:$0xf] }
 0x103   :  { %v2038_v39 = vor.u32 %v2455_v32, %v2035_v14  ;;  %v2529_v32 = vld [vmem:[%s3767_s1 + $0x594] sm:$0xf] }
 0x104   :  { %1430 = vmatmul.bf16.vlgmr.msrb.gmra.mxu0 %v270_v61  ;;  %1443 = vmatmul.bf16.vlgmr.msrb.gmra.mxu1 %v271_v2  ;;  %v1341_v29 = vadd.f32 %v1340_v28, %v1328_v27  ;;  %v1841_v61 = vld [vmem:[%s3767_s1 + $0x1c0] sm:$0xf]  ;;  %v2420_v2 = vld [vmem:[%s3767_s1 + $0x224] sm:$0xf0]  ;;  %v2360_v28 = vld [vmem:[%s3767_s1 + $0x4c] sm:$0xf] }
 0x105   :  { %1474 = vmatpush.bf16.xpose.msra.mxu0 %v2322_v53  ;;  %1487 = vmatpush.bf16.xpose.msra.mxu1 %v2326_v54  ;;  %v2432_v53 = vld [vmem:[%s3767_s1 + $0x28c] sm:$0xf]  ;;  %v1842_v5 = vor.u32 %v2419_v62, %v1841_v61  ;;  %v2372_v27 = vld [vmem:[%s3767_s1 + $0xa4] sm:$0xf0]  ;;  %v2339_v14 = vld [vmem:[%s3767_s1 + $0x5f0] sm:$0xf0] }
 0x106   :  { %1500 = vmatpush.bf16.xpose.msra.mxu2 %v2330_v55  ;;  %1469 = vmatmul.bf16.vlgmr.msrb.gmra.mxu3 %v273_v6  ;;  %v1947_v54 = vld [vmem:[%s3767_s1 + $0x2e8] sm:$0xf0]  ;;  %v1938_v55 = vor.u32 %v2443_v48, %v1937_v47  ;;  %v1846_v6 = vor.u32 %v2407_v63, %v1843_v0  ;;  %v250_v47 = vunpack.c.l.b16 %v22_v36  ;;  %v2506_v62 = vld [vmem:[%s3767_s1 + $0x4dc] sm:$0xf] }
 0x107   :  { %1513 = vmatpush.bf16.xpose.msra.mxu3 %v2334_v57  ;;  %1456 = vmatmul.bf16.vlgmr.msrb.gmra.mxu2 %v272_v1  ;;  %v1946_v57 = vor.u32 %v2444_v52, %v1945_v51  ;;  %v1950_v59 = vor.u32 %v2432_v53, %v1947_v54  ;;  %v1849_v1 = vld [vmem:[%s3767_s1 + $0x1c8] sm:$0xf]  ;;  %v2241_v53 = vld [vmem:[%s3767_s1 + $0x4d0] sm:$0xf]  ;;  %v2251_v63 = vld [vmem:[%s3767_s1 + $0x538] sm:$0xf0] }
 0x108   :  { %v1850_v7 = vor.u32 %v2420_v2, %v1849_v1  ;;  %v274_v52 = vpack.c.b16 %v250_v47, %v250_v47  ;;  %v2517_v54 = vld [vmem:[%s3767_s1 + $0x52c] sm:$0xf0]  ;;  %v2254_v3 = vor.u32 %v2506_v62, %v2251_v63 }
 0x109   :  { %v1366_v43 = vpop.f32.mrf.mxu3  ;;  %v1329_v44 = vpop.f32.mrf.mxu0  ;;  %v2242_v0 = vor.u32 %v2517_v54, %v2241_v53  ;;  %v2421_v53 = vld [vmem:[%s3767_s1 + $0x22c] sm:$0xf0]  ;;  %v2409_v54 = vld [vmem:[%s3767_s1 + $0x1d4] sm:$0xf] }
 0x10a   :  { %v1353_v38 = vpop.f32.mrf.mxu2  ;;  %v1342_v45 = vpop.f32.mrf.mxu1  ;;  %v2342_v44 = vor.u32 %v2529_v32, %v2339_v14 }
 0x10b   :  { %v1354_v41 = vadd.f32 %v1353_v38, %v1341_v29  ;;  %v1659_v29 = vld [vmem:[%s3767_s1 + $0xa8] sm:$0xf0]  ;;  %v1658_v38 = vor.u32 %v2372_v27, %v1657_v26  ;;  %v2346_v45 = vor.u32 %v2542_v35, %v2345_v34  ;;  %v2458_v26 = vld [vmem:[%s3767_s1 + $0x35c] sm:$0xf] }
 0x10c   :  { %v2059_v27 = vld [vmem:[%s3767_s1 + $0x3b8] sm:$0xf0] }
 0x10d   :  { %1475 = vmatpush.bf16.xpose.msra.mxu0 %v2226_v9  ;;  %1488 = vmatpush.bf16.xpose.msra.mxu1 %v2230_v10  ;;  %v3458_v46 = vadd.f32 %v1366_v43, %v1354_v41  ;;  %v1745_v9 = vld [vmem:[%s3767_s1 + $0x100] sm:$0xf]  ;;  %v23_v41 = vld [vmem:[%s3768_s0 + $0x48] sm:$0xff]  ;;  %v2338_v43 = vor.u32 %v2541_v31, %v2337_v30  ;;  %v2062_v14 = vor.u32 %v2458_v26, %v2059_v27 }
 0x10e   :  { %1501 = vmatpush.bf16.xpose.msra.mxu2 %v2234_v11  ;;  %v2395_v10 = vld [vmem:[%s3767_s1 + $0x15c] sm:$0xf0]  ;;  %v2383_v11 = vld [vmem:[%s3767_s1 + $0x104] sm:$0xf]  ;;  %v252_v49 = vunpack.c.l.b16 %v23_v41  ;;  %v253_v51 = vunpack.c.h.b16 %v23_v41  ;;  %v1961_v41 = vld [vmem:[%s3767_s1 + $0x298] sm:$0xf] }
 0x10f   :  { %1514 = vmatpush.bf16.xpose.msra.mxu3 %v2238_v12  ;;  %v1747_v12 = vld [vmem:[%s3767_s1 + $0x160] sm:$0xf0]  ;;  %v1746_v18 = vor.u32 %v2395_v10, %v1745_v9  ;;  %v2494_v9 = vld [vmem:[%s3767_s1 + $0x474] sm:$0xf0]  ;;  %v2482_v10 = vld [vmem:[%s3767_s1 + $0x41c] sm:$0xf] }
 0x110   :  { %v1750_v19 = vor.u32 %v2383_v11, %v1747_v12  ;;  %v277_v61 = vpack.c.b16 %v253_v51, %v253_v51  ;;  %v2155_v11 = vld [vmem:[%s3767_s1 + $0x478] sm:$0xf0] }
 0x111   :  { %v1368_v60 = vpop.f32.mrf.mxu3  ;;  %v2158_v16 = vor.u32 %v2482_v10, %v2155_v11 }
 0x112   :  { %v1355_v58 = vpop.f32.mrf.mxu2  ;;  %v2518_v60 = vld [vmem:[%s3767_s1 + $0x534] sm:$0xf0] }
 0x113   :  { %v2243_v58 = vld [vmem:[%s3767_s1 + $0x530] sm:$0xf0] }
 0x115   :  { %1476 = vmatpush.bf16.xpose.msra.mxu0 %v2130_v22  ;;  %1489 = vmatpush.bf16.xpose.msra.mxu1 %v2134_v23  ;;  %v1649_v22 = vld [vmem:[%s3767_s1 + $0x40] sm:$0xf] }
 0x116   :  { %1502 = vmatpush.bf16.xpose.msra.mxu2 %v2138_v24  ;;  %v2371_v23 = vld [vmem:[%s3767_s1 + $0x9c] sm:$0xf0]  ;;  %v2359_v24 = vld [vmem:[%s3767_s1 + $0x44] sm:$0xf] }
 0x117   :  { %1515 = vmatpush.bf16.xpose.msra.mxu3 %v2142_v25  ;;  %v1651_v25 = vld [vmem:[%s3767_s1 + $0xa0] sm:$0xf0]  ;;  %v1650_v33 = vor.u32 %v2371_v23, %v1649_v22  ;;  %v2469_v22 = vld [vmem:[%s3767_s1 + $0x3ac] sm:$0xf0]  ;;  %v2457_v23 = vld [vmem:[%s3767_s1 + $0x354] sm:$0xf] }
 0x11d   :  { %1477 = vmatpush.bf16.xpose.msra.mxu0 %v2034_v37  ;;  %1490 = vmatpush.bf16.xpose.msra.mxu1 %v2038_v39  ;;  %v1654_v37 = vor.u32 %v2359_v24, %v1651_v25  ;;  %v2530_v39 = vld [vmem:[%s3767_s1 + $0x59c] sm:$0xf]  ;;  %v2057_v24 = vld [vmem:[%s3767_s1 + $0x358] sm:$0xf] }
 0x11e   :  { %1503 = vmatpush.bf16.xpose.msra.mxu2 %v2042_v40  ;;  %v2347_v40 = vld [vmem:[%s3767_s1 + $0x5f8] sm:$0xf0]  ;;  %v2470_v25 = vld [vmem:[%s3767_s1 + $0x3b4] sm:$0xf0] }
 0x11f   :  { %1516 = vmatpush.bf16.xpose.msra.mxu3 %v2046_v42  ;;  %v1662_v42 = vor.u32 %v2360_v28, %v1659_v29  ;;  %v2350_v48 = vor.u32 %v2530_v39, %v2347_v40  ;;  %v2058_v31 = vor.u32 %v2470_v25, %v2057_v24  ;;  %v2433_v39 = vld [vmem:[%s3767_s1 + $0x294] sm:$0xf]  ;;  %v25_v24 = vld [vmem:[%s3768_s0 + $0x58] sm:$0xff] }
 0x120   :  { %v1955_v40 = vld [vmem:[%s3767_s1 + $0x2f0] sm:$0xf0] }
 0x121   :  { %v1958_v47 = vor.u32 %v2433_v39, %v1955_v40 }
 0x125   :  { %1478 = vmatpush.bf16.xpose.msra.mxu0 %v1938_v55  ;;  %1491 = vmatpush.bf16.xpose.msra.mxu1 %v1942_v56  ;;  %v2505_v55 = vld [vmem:[%s3767_s1 + $0x4d4] sm:$0xf]  ;;  %v276_v56 = vpack.c.b16 %v252_v49, %v252_v49 }
 0x126   :  { %1504 = vmatpush.bf16.xpose.msra.mxu2 %v1946_v57  ;;  %v275_v57 = vpack.c.b16 %v251_v50, %v251_v50  ;;  %v2246_v1 = vor.u32 %v2505_v55, %v2243_v58  ;;  %v1859_v55 = vld [vmem:[%s3767_s1 + $0x230] sm:$0xf0]  ;;  %v2410_v58 = vld [vmem:[%s3767_s1 + $0x1dc] sm:$0xf] }
 0x127   :  { %1517 = vmatpush.bf16.xpose.msra.mxu3 %v1950_v59  ;;  %v2249_v59 = vld [vmem:[%s3767_s1 + $0x4d8] sm:$0xf] }
 0x128   :  { %v2250_v2 = vor.u32 %v2518_v60, %v2249_v59  ;;  %v1867_v59 = vld [vmem:[%s3767_s1 + $0x238] sm:$0xf0] }
 0x129   :  { %v1870_v63 = vor.u32 %v2410_v58, %v1867_v59 }
 0x12d   :  { %1479 = vmatpush.bf16.xpose.msra.mxu0 %v1842_v5  ;;  %1492 = vmatpush.bf16.xpose.msra.mxu1 %v1846_v6  ;;  %v2493_v5 = vld [vmem:[%s3767_s1 + $0x46c] sm:$0xf0]  ;;  %v2481_v6 = vld [vmem:[%s3767_s1 + $0x414] sm:$0xf] }
 0x12e   :  { %1505 = vmatpush.bf16.xpose.msra.mxu2 %v1850_v7  ;;  %v2147_v7 = vld [vmem:[%s3767_s1 + $0x470] sm:$0xf0]  ;;  %v2146_v12 = vor.u32 %v2493_v5, %v2145_v4  ;;  %v1769_v4 = vld [vmem:[%s3767_s1 + $0x118] sm:$0xf] }
 0x12f   :  { %1518 = vmatpush.bf16.xpose.msra.mxu3 %v1854_v8  ;;  %v2153_v8 = vld [vmem:[%s3767_s1 + $0x418] sm:$0xf]  ;;  %v2150_v13 = vor.u32 %v2481_v6, %v2147_v7  ;;  %v2386_v6 = vld [vmem:[%s3767_s1 + $0x11c] sm:$0xf] }
 0x130   :  { %v2154_v15 = vor.u32 %v2494_v9, %v2153_v8  ;;  %v2398_v5 = vld [vmem:[%s3767_s1 + $0x174] sm:$0xf0]  ;;  %v1771_v7 = vld [vmem:[%s3767_s1 + $0x178] sm:$0xf0] }
 0x131   :  { %v1770_v10 = vor.u32 %v2398_v5, %v1769_v4  ;;  %v1774_v11 = vor.u32 %v2386_v6, %v1771_v7 }
 0x135   :  { %1480 = vmatpush.bf16.xpose.msra.mxu0 %v1746_v18  ;;  %1493 = vmatpush.bf16.xpose.msra.mxu1 %v1750_v19 }
 0x136   :  { %1506 = vmatpush.bf16.xpose.msra.mxu2 %v1754_v20 }
 0x137   :  { %1519 = vmatpush.bf16.xpose.msra.mxu3 %v1758_v21  ;;  %v2049_v21 = vld [vmem:[%s3767_s1 + $0x350] sm:$0xf] }
 0x138   :  { %v2050_v28 = vor.u32 %v2469_v22, %v2049_v21  ;;  %v24_v22 = vld [vmem:[%s3768_s0 + $0x50] sm:$0xff] }
 0x139   :  { %v254_v26 = vunpack.c.l.b16 %v24_v22  ;;  %v255_v27 = vunpack.c.h.b16 %v24_v22 }
 0x13d   :  { %1481 = vmatpush.bf16.xpose.msra.mxu0 %v1650_v33  ;;  %1494 = vmatpush.bf16.xpose.msra.mxu1 %v1654_v37  ;;  %v1953_v37 = vld [vmem:[%s3767_s1 + $0x290] sm:$0xf] }
 0x13e   :  { %1507 = vmatpush.bf16.xpose.msra.mxu2 %v1658_v38  ;;  %v2445_v38 = vld [vmem:[%s3767_s1 + $0x2ec] sm:$0xf0] }
 0x13f   :  { %1520 = vmatpush.bf16.xpose.msra.mxu3 %v1662_v42  ;;  %v2446_v42 = vld [vmem:[%s3767_s1 + $0x2f4] sm:$0xf0] }
 0x141   :  { %v1379_v17 = vpop.f32.mrf.mxu0  ;;  %v1392_v19 = vpop.f32.mrf.mxu1 }
 0x142   :  { %v1380_v18 = vadd.f32 %v1379_v17, %v3458_v46  ;;  %v2051_v46 = vld [vmem:[%s3767_s1 + $0x3b0] sm:$0xf0]  ;;  %v1673_v17 = vld [vmem:[%s3767_s1 + $0x58] sm:$0xf] }
 0x143   :  { %v2054_v30 = vor.u32 %v2457_v23, %v2051_v46 }
 0x144   :  { %1482 = vmatmul.bf16.vlgmr.msra.gmra.mxu0 %v274_v52  ;;  %1495 = vmatmul.bf16.vlgmr.msra.gmra.mxu1 %v275_v57  ;;  %v1393_v20 = vadd.f32 %v1392_v19, %v1380_v18  ;;  %v1857_v52 = vld [vmem:[%s3767_s1 + $0x1d0] sm:$0xf]  ;;  %v2422_v57 = vld [vmem:[%s3767_s1 + $0x234] sm:$0xf0]  ;;  %v2362_v19 = vld [vmem:[%s3767_s1 + $0x5c] sm:$0xf] }
 0x145   :  { %1526 = vmatpush.bf16.xpose.msrb.mxu0 %v2338_v43  ;;  %1539 = vmatpush.bf16.xpose.msrb.mxu1 %v2342_v44  ;;  %v2434_v43 = vld [vmem:[%s3767_s1 + $0x29c] sm:$0xf]  ;;  %v1858_v60 = vor.u32 %v2421_v53, %v1857_v52  ;;  %v2374_v18 = vld [vmem:[%s3767_s1 + $0xb4] sm:$0xf0] }
 0x146   :  { %1552 = vmatpush.bf16.xpose.msrb.mxu2 %v2346_v45  ;;  %1521 = vmatmul.bf16.vlgmr.msra.gmra.mxu3 %v277_v61  ;;  %v1963_v44 = vld [vmem:[%s3767_s1 + $0x2f8] sm:$0xf0]  ;;  %v1954_v45 = vor.u32 %v2445_v38, %v1953_v37  ;;  %v1862_v61 = vor.u32 %v2409_v54, %v1859_v55  ;;  %v1674_v46 = vor.u32 %v2374_v18, %v1673_v17 }
 0x147   :  { %1565 = vmatpush.bf16.xpose.msrb.mxu3 %v2350_v48  ;;  %1508 = vmatmul.bf16.vlgmr.msra.gmra.mxu2 %v276_v56  ;;  %v1962_v48 = vor.u32 %v2446_v42, %v1961_v41  ;;  %v1966_v50 = vor.u32 %v2434_v43, %v1963_v44  ;;  %v1865_v56 = vld [vmem:[%s3767_s1 + $0x1d8] sm:$0xf] }
 0x148   :  { %v1866_v62 = vor.u32 %v2422_v57, %v1865_v56 }
 0x149   :  { %v1418_v33 = vpop.f32.mrf.mxu3  ;;  %v1381_v34 = vpop.f32.mrf.mxu0 }
 0x14a   :  { %v1405_v29 = vpop.f32.mrf.mxu2  ;;  %v1394_v35 = vpop.f32.mrf.mxu1 }
 0x14b   :  { %v1406_v32 = vadd.f32 %v1405_v29, %v1393_v20  ;;  %v1675_v20 = vld [vmem:[%s3767_s1 + $0xb8] sm:$0xf0]  ;;  %v257_v29 = vunpack.c.h.b16 %v25_v24 }
 0x14c   :  { %v1678_v25 = vor.u32 %v2362_v19, %v1675_v20 }
 0x14d   :  { %1527 = vmatpush.bf16.xpose.msrb.mxu0 %v2242_v0  ;;  %1540 = vmatpush.bf16.xpose.msrb.mxu1 %v2246_v1  ;;  %v3659_v36 = vadd.f32 %v1418_v33, %v1406_v32  ;;  %v1761_v0 = vld [vmem:[%s3767_s1 + $0x110] sm:$0xf] }
 0x14e   :  { %1553 = vmatpush.bf16.xpose.msrb.mxu2 %v2250_v2  ;;  %v2397_v1 = vld [vmem:[%s3767_s1 + $0x16c] sm:$0xf0]  ;;  %v2385_v2 = vld [vmem:[%s3767_s1 + $0x114] sm:$0xf] }
 0x14f   :  { %1566 = vmatpush.bf16.xpose.msrb.mxu3 %v2254_v3  ;;  %v1763_v3 = vld [vmem:[%s3767_s1 + $0x170] sm:$0xf0]  ;;  %v1762_v8 = vor.u32 %v2397_v1, %v1761_v0 }
 0x150   :  { %v1766_v9 = vor.u32 %v2385_v2, %v1763_v3 }
 0x151   :  { %v1420_v51 = vpop.f32.mrf.mxu3 }
 0x152   :  { %v1407_v49 = vpop.f32.mrf.mxu2 }
 0x155   :  { %1528 = vmatpush.bf16.xpose.msrb.mxu0 %v2146_v12  ;;  %1541 = vmatpush.bf16.xpose.msrb.mxu1 %v2150_v13  ;;  %v1665_v12 = vld [vmem:[%s3767_s1 + $0x50] sm:$0xf] }
 0x156   :  { %1554 = vmatpush.bf16.xpose.msrb.mxu2 %v2154_v15  ;;  %v2373_v13 = vld [vmem:[%s3767_s1 + $0xac] sm:$0xf0]  ;;  %v2361_v15 = vld [vmem:[%s3767_s1 + $0x54] sm:$0xf] }
 0x157   :  { %1567 = vmatpush.bf16.xpose.msrb.mxu3 %v2158_v16  ;;  %v1667_v16 = vld [vmem:[%s3767_s1 + $0xb0] sm:$0xf0]  ;;  %v1666_v21 = vor.u32 %v2373_v13, %v1665_v12 }
 0x158   :  { %v1670_v23 = vor.u32 %v2361_v15, %v1667_v16 }
 0x15d   :  { %1529 = vmatpush.bf16.xpose.msrb.mxu0 %v2050_v28  ;;  %1542 = vmatpush.bf16.xpose.msrb.mxu1 %v2054_v30  ;;  %v256_v28 = vunpack.c.l.b16 %v25_v24  ;;  %v278_v30 = vpack.c.b16 %v254_v26, %v254_v26 }
 0x15e   :  { %1555 = vmatpush.bf16.xpose.msrb.mxu2 %v2058_v31  ;;  %v279_v31 = vpack.c.b16 %v255_v27, %v255_v27 }
 0x15f   :  { %1568 = vmatpush.bf16.xpose.msrb.mxu3 %v2062_v14  ;;  %v280_v32 = vpack.c.b16 %v256_v28, %v256_v28  ;;  %v281_v14 = vpack.c.b16 %v257_v29, %v257_v29 }
 0x165   :  { %1530 = vmatpush.bf16.xpose.msrb.mxu0 %v1954_v45  ;;  %1543 = vmatpush.bf16.xpose.msrb.mxu1 %v1958_v47 }
 0x166   :  { %1556 = vmatpush.bf16.xpose.msrb.mxu2 %v1962_v48 }
 0x167   :  { %1569 = vmatpush.bf16.xpose.msrb.mxu3 %v1966_v50 }
 0x16d   :  { %1531 = vmatpush.bf16.xpose.msrb.mxu0 %v1858_v60  ;;  %1544 = vmatpush.bf16.xpose.msrb.mxu1 %v1862_v61 }
 0x16e   :  { %1557 = vmatpush.bf16.xpose.msrb.mxu2 %v1866_v62 }
 0x16f   :  { %1570 = vmatpush.bf16.xpose.msrb.mxu3 %v1870_v63 }
 0x175   :  { %1532 = vmatpush.bf16.xpose.msrb.mxu0 %v1762_v8  ;;  %1545 = vmatpush.bf16.xpose.msrb.mxu1 %v1766_v9 }
 0x176   :  { %1558 = vmatpush.bf16.xpose.msrb.mxu2 %v1770_v10 }
 0x177   :  { %1571 = vmatpush.bf16.xpose.msrb.mxu3 %v1774_v11 }
 0x17d   :  { %1533 = vmatpush.bf16.xpose.msrb.mxu0 %v1666_v21  ;;  %1546 = vmatpush.bf16.xpose.msrb.mxu1 %v1670_v23 }
 0x17e   :  { %1559 = vmatpush.bf16.xpose.msrb.mxu2 %v1674_v46 }
 0x17f   :  { %1572 = vmatpush.bf16.xpose.msrb.mxu3 %v1678_v25 }
 0x181   :  { %v1431_v33 = vpop.f32.mrf.mxu0  ;;  %v1444_v35 = vpop.f32.mrf.mxu1 }
 0x182   :  { %v1432_v34 = vadd.f32 %v1431_v33, %v3659_v36 }
 0x184   :  { %1534 = vmatmul.bf16.vlgmr.msrb.gmra.mxu0 %v278_v30  ;;  %1547 = vmatmul.bf16.vlgmr.msrb.gmra.mxu1 %v279_v31  ;;  %v1445_v37 = vadd.f32 %v1444_v35, %v1432_v34 }
 0x185   :  { %1560 = vmatmul.bf16.vlgmr.msrb.gmra.mxu2 %v280_v32 }
 0x186   :  { %1573 = vmatmul.bf16.vlgmr.msrb.gmra.mxu3 %v281_v14 }
 0x189   :  { %v1470_v40 = vpop.f32.mrf.mxu3  ;;  %v1433_v41 = vpop.f32.mrf.mxu0 }
 0x18a   :  { %v1457_v38 = vpop.f32.mrf.mxu2  ;;  %v1446_v42 = vpop.f32.mrf.mxu1 }
 0x18b   :  { %v1458_v39 = vadd.f32 %v1457_v38, %v1445_v37 }
 0x18d   :  { %v1471_v43 = vadd.f32 %v1470_v40, %v1458_v39 }
 0x191   :  { %v1472_v45 = vpop.f32.mrf.mxu3 }
 0x192   :  { %v1459_v44 = vpop.f32.mrf.mxu2 }
 0x1c1   :  { %v1483_v47 = vpop.f32.mrf.mxu0  ;;  %v1496_v48 = vpop.f32.mrf.mxu1 }
 0x1c2   :  { %v1484_v55 = vadd.f32 %v1483_v47, %v1471_v43 }
 0x1c4   :  { %v1497_v36 = vadd.f32 %v1496_v48, %v1484_v55 }
 0x1c9   :  { %v1522_v50 = vpop.f32.mrf.mxu3  ;;  %v1485_v51 = vpop.f32.mrf.mxu0 }
 0x1ca   :  { %v1509_v49 = vpop.f32.mrf.mxu2  ;;  %v1498_v52 = vpop.f32.mrf.mxu1 }
 0x1cb   :  { %v1510_v56 = vadd.f32 %v1509_v49, %v1497_v36 }
 0x1cd   :  { %v1523_v57 = vadd.f32 %v1522_v50, %v1510_v56 }
 0x1d1   :  { %v1524_v54 = vpop.f32.mrf.mxu3 }
 0x1d2   :  { %v1511_v53 = vpop.f32.mrf.mxu2 }
 0x201   :  { %v1535_v58 = vpop.f32.mrf.mxu0  ;;  %v1548_v59 = vpop.f32.mrf.mxu1 }
 0x202   :  { %v1536_v60 = vadd.f32 %v1535_v58, %v1523_v57 }
 0x204   :  { %v1549_v61 = vadd.f32 %v1548_v59, %v1536_v60 }
 0x208   :  { %v1561_v62 = vpop.f32.mrf.mxu2 }
 0x209   :  { %v1562_v63 = vadd.f32 %v1561_v62, %v1549_v61  ;;  %v1574_v0 = vpop.f32.mrf.mxu3  ;;  %v1537_v1 = vpop.f32.mrf.mxu0 }
 0x20a   :  { %v1550_v2 = vpop.f32.mrf.mxu1 }
 0x20b   :  { %v1575_v3 = vadd.f32 %v1574_v0, %v1562_v63 }
 0x20d   :  { %1578 = vst [vmem:[%s3770_s3] sm:$0xff] %v1575_v3 }
 0x210   :  { %v1563_v4 = vpop.f32.mrf.mxu2 }
 0x211   :  { %v1576_v5 = vpop.f32.mrf.mxu3 }

</bundles_post_ra>
